<compile_context>
chip_gen: v7x
topology: tpu7x:2x2x1
jax: 0.10.0
libtpu: 0.0.40
codegen_flags: <defaults>
</compile_context>

<pallas_src>
import numpy as np
import jax
import jax.numpy as jnp
from jax.experimental import pallas as pl
from jax.experimental.pallas import tpu as pltpu

# ----- module hyper-parameters (SCAttBlock(op_channel=8, group_kernel_size=3)) -----
OP_CHANNEL = 8
GROUP_NUM = 4
GATE_THRESHOLD = 0.5
ALPHA = 0.5
SQUEEZE_RADIO = 2
GROUP_SIZE = 2
GKS = 3
EPS = 1e-10

UP_CH = int(ALPHA * OP_CHANNEL)            # 4
LOW_CH = OP_CHANNEL - UP_CH                # 4
UP_SQ = UP_CH // SQUEEZE_RADIO             # 2
LOW_SQ = LOW_CH // SQUEEZE_RADIO           # 2
PWC2_OUT = OP_CHANNEL - LOW_SQ             # 6
IN_PER_GROUP = UP_SQ // GROUP_SIZE         # 1
OUT_PER_GROUP = OP_CHANNEL // GROUP_SIZE   # 4

MATMUL_DTYPE = jnp.bfloat16                # MXU operand dtype (accumulation stays f32)


def _make_kernel(W, HW, SLAB, group_elems, mdt):
    """Kernel over a (TN*C, H*W) block: rows sample-major / channel-minor (C==8)."""
    inv_ge = 1.0 / float(group_elems)
    inv_gem1 = 1.0 / float(group_elems - 1)

    def kernel(x_ref, rowp_ref, mask_ref, msq1_ref, msq2_ref, mtap_ref, my2_ref,
               o_ref, tap_buf):
        R = x_ref.shape[0]
        x = x_ref[...]                                    # (R, HW) f32
        rp = rowp_ref[...]                                # (R, 8)  f32
        gnw, gnb = rp[:, 0:1], rp[:, 1:2]
        wg, bg = rp[:, 2:3], rp[:, 3:4]
        f4 = rp[:, 4:5] > 0.5                             # row % 8 < 4
        f2 = rp[:, 5:6] > 0.5                             # row % 4 < 2
        f1 = rp[:, 6:7] > 0.5                             # row % 2 == 0

        def shift_sel(v, k, flag):
            # flag ? v[row + k] : v[row - k]; stays inside each 8-row sample block,
            # so the circular wrap of the roll is never selected.
            return jnp.where(flag,
                             pltpu.roll(v, (R - k) % R, axis=0),
                             pltpu.roll(v, k, axis=0))

        # ---------------- SRU: GroupBatchnorm2d over adjacent channel pairs --------
        s = jnp.sum(x, axis=1, keepdims=True)             # per-row sums (R, 1)
        mean = (s + shift_sel(s, 1, f1)) * inv_ge         # pair-sum -> group mean
        dev = x - mean
        ssq = jnp.sum(dev * dev, axis=1, keepdims=True)
        var = (ssq + shift_sel(ssq, 1, f1)) * inv_gem1    # unbiased (torch.std)
        inv_std = 1.0 / (jnp.sqrt(var) + EPS)             # EPS added to std
        gn = dev * (inv_std * gnw) + gnb

        # ---------------- SRU: sigmoid gating + cross-half reconstruct -------------
        rew = jax.nn.sigmoid(gn * wg)
        x1 = jnp.where(rew >= GATE_THRESHOLD, gn, 0.0)
        x2 = gn - x1                                      # complementary mask
        sru = x1 + shift_sel(x2, 4, f4)                   # half-swap via sublane roll

        # ---------------- CRU: squeeze 1x1 convs (block-diagonal matmuls) ----------
        sru_m = sru.astype(mdt)
        up_s = jnp.dot(msq1_ref[...], sru_m,
                       preferred_element_type=jnp.float32)    # (SLAB, HW)
        low_s = jnp.dot(msq2_ref[...], sru_m,
                        preferred_element_type=jnp.float32)   # (TN*LOW_SQ, HW)

        # ---------------- CRU: GWC(3x3 grouped, 'same') + PWC1 as ONE fused matmul -
        masks = mask_ref[...]                             # (9, HW) 0/1 edge masks
        for ky in range(GKS):
            for kx in range(GKS):
                t = ky * GKS + kx
                d = (ky - 1) * W + (kx - 1)               # flat spatial shift
                if d == 0:
                    tap = up_s                            # centre tap: no shift/mask
                else:
                    tap = pltpu.roll(up_s, (-d) % HW, axis=1) * masks[t:t + 1, :]
                tap_buf[t * SLAB:(t + 1) * SLAB, :] = tap.astype(mdt)
        y1 = jnp.dot(mtap_ref[...], tap_buf[...],
                     preferred_element_type=jnp.float32) + bg

        # ---------------- CRU: cat([PWC2(low), low]) as one matmul -----------------
        y2 = jnp.dot(my2_ref[...], low_s.astype(mdt),
                     preferred_element_type=jnp.float32)      # (R, HW)

        # ---------------- channel attention: softmax over pooled 2*C channels ------
        p1 = jnp.mean(y1, axis=1, keepdims=True)          # (R, 1)
        p2 = jnp.mean(y2, axis=1, keepdims=True)
        gmax = jnp.max(jnp.maximum(p1, p2), axis=0, keepdims=True)   # shift-invariant
        e1 = jnp.exp(p1 - gmax)
        e2 = jnp.exp(p2 - gmax)
        den = e1 + e2                                     # per-sample sum: 3-level
        den = den + shift_sel(den, 4, f4)                 # butterfly over the 8 rows
        den = den + shift_sel(den, 2, f2)                 # of each sample block
        den = den + shift_sel(den, 1, f1)
        inv_den = pl.reciprocal(den, approx=False)
        o_ref[...] = y1 * (e1 * inv_den) + y2 * (e2 * inv_den)

    return kernel


def _round_up(v, m):
    return -(-v // m) * m


def _pick_tn(n, c, max_rows=256):
    # One big block per grid step: largest divisor TN of N with R = TN*C <= 256
    # (v6e/v7x MXU contraction depth; v5e prefers <= 128 but N is tiny here).
    cap = max(1, max_rows // c)
    for t in range(min(n, cap), 0, -1):
        if n % t == 0:
            return t
    return 1


def _tap_edge_masks(H, W):
    hw = H * W
    r = np.arange(hw) // W
    c = np.arange(hw) % W
    m = np.zeros((GKS * GKS, hw), np.float32)
    for ky in range(GKS):
        for kx in range(GKS):
            dy, dx = ky - 1, kx - 1
            ok = (r + dy >= 0) & (r + dy < H) & (c + dx >= 0) & (c + dx < W)
            m[ky * GKS + kx] = ok.astype(np.float32)
    return m


def scatt_block(x, params):
    N, C, H, W = x.shape
    assert C == OP_CHANNEL
    gn_w, gn_b, w_sq1, w_sq2, w_gwc, b_gwc, w_pwc1, w_pwc2 = params
    x = x.astype(jnp.float32)
    hw = H * W
    group_elems = (C // GROUP_NUM) * hw                   # elements per GN group

    TN = _pick_tn(N, C)
    R = TN * C
    TSQ = TN * UP_SQ
    TLQ = TN * LOW_SQ
    SLAB = _round_up(TSQ, 16)       # bf16-tile-aligned slab height in the tap scratch
    mdt = MATMUL_DTYPE

    eye_tn = jnp.eye(TN, dtype=jnp.float32)

    # ---- per-row parameters + sublane parity flags, merged into one (R,8) operand
    c_idx = jnp.tile(jnp.arange(C), TN)                   # channel index per row
    w_gamma = gn_w / jnp.sum(gn_w)
    per_ch = lambda v: jnp.tile(v.reshape(C), (TN,))
    rowp = jnp.stack(
        [per_ch(gn_w), per_ch(gn_b), per_ch(w_gamma), per_ch(b_gwc),
         (c_idx % C < C // 2).astype(jnp.float32),        # row % 8 < 4
         (c_idx % (C // 2) < C // 4).astype(jnp.float32), # row % 4 < 2
         (c_idx % 2 == 0).astype(jnp.float32),            # row even
         jnp.zeros((R,), jnp.float32)], axis=1)           # (R, 8)

    # ---- 0/1 masks zeroing the circular-roll wrap positions of each 3x3 tap ----
    tap_masks = jnp.asarray(_tap_edge_masks(H, W))        # (9, HW)

    # ---- block-diagonal channel-mixing matrices (bf16 operands, f32 accumulate) --
    sq1_blk = jnp.concatenate([w_sq1, jnp.zeros((UP_SQ, LOW_CH), jnp.float32)], axis=1)
    m_sq1 = jnp.kron(eye_tn, sq1_blk)                     # (TSQ, R)
    if SLAB > TSQ:
        m_sq1 = jnp.concatenate(
            [m_sq1, jnp.zeros((SLAB - TSQ, R), jnp.float32)], axis=0)
    m_sq1 = m_sq1.astype(mdt)                             # (SLAB, R)

    sq2_blk = jnp.concatenate([jnp.zeros((LOW_SQ, UP_CH), jnp.float32), w_sq2], axis=1)
    m_sq2 = jnp.kron(eye_tn, sq2_blk).astype(mdt)         # (TLQ, R)

    gsel = np.zeros((OP_CHANNEL, IN_PER_GROUP, UP_SQ), np.float32)
    for o in range(OP_CHANNEL):
        for cig in range(IN_PER_GROUP):
            gsel[o, cig, (o // OUT_PER_GROUP) * IN_PER_GROUP + cig] = 1.0
    gsel = jnp.asarray(gsel)
    taps = []
    for ky in range(GKS):
        for kx in range(GKS):
            wt = jnp.einsum('oi,oic->oc', w_gwc[:, :, ky, kx], gsel)   # (C, UP_SQ)
            if ky == GKS // 2 and kx == GKS // 2:
                wt = wt + w_pwc1                          # fold PWC1 into centre tap
            blk = jnp.kron(eye_tn, wt)                                 # (R, TSQ)
            if SLAB > TSQ:
                blk = jnp.concatenate(
                    [blk, jnp.zeros((R, SLAB - TSQ), jnp.float32)], axis=1)
            taps.append(blk)
    m_tap = jnp.concatenate(taps, axis=1).astype(mdt)     # (R, 9*SLAB), fused GWC+PWC1

    m_y2 = jnp.kron(eye_tn, jnp.concatenate(
        [w_pwc2, jnp.eye(LOW_SQ, dtype=jnp.float32)], axis=0)).astype(mdt)  # (R, TLQ)

    x2d = x.reshape(N * C, hw)                            # lane-dense layout

    def _full(a):
        nd = a.ndim
        return pl.BlockSpec(a.shape, lambda i, _nd=nd: (0,) * _nd)

    out2d = pl.pallas_call(
        _make_kernel(W, hw, SLAB, group_elems, mdt),
        out_shape=jax.ShapeDtypeStruct((N * C, hw), jnp.float32),
        grid=(N // TN,),
        in_specs=[
            pl.BlockSpec((R, hw), lambda i: (i, 0)),
            _full(rowp), _full(tap_masks),
            _full(m_sq1), _full(m_sq2), _full(m_tap), _full(m_y2),
        ],
        out_specs=pl.BlockSpec((R, hw), lambda i: (i, 0)),
        scratch_shapes=[pltpu.VMEM((GKS * GKS * SLAB, hw), mdt)],
        compiler_params=pltpu.CompilerParams(dimension_semantics=("parallel",)),
    )(x2d, rowp, tap_masks, m_sq1, m_sq2, m_tap, m_y2)
    return out2d.reshape(N, C, H, W)


# -------------------- pure-JAX reference (mirrors the torch module) --------------------
def reference(x, params):
    gn_w, gn_b, w_sq1, w_sq2, w_gwc, b_gwc, w_pwc1, w_pwc2 = params
    N, C, H, W = x.shape
    xg = x.reshape(N, GROUP_NUM, -1)
    mean = xg.mean(axis=2, keepdims=True)
    std = jnp.std(xg, axis=2, keepdims=True, ddof=1)
    xn = ((xg - mean) / (std + EPS)).reshape(N, C, H, W)
    gn_x = xn * gn_w.reshape(1, C, 1, 1) + gn_b.reshape(1, C, 1, 1)
    w_gamma = (gn_w / jnp.sum(gn_w)).reshape(1, C, 1, 1)
    rew = jax.nn.sigmoid(gn_x * w_gamma)
    info = (rew >= GATE_THRESHOLD).astype(x.dtype)
    x1, x2 = info * gn_x, (1.0 - info) * gn_x
    half = C // 2
    sru = jnp.concatenate([x1[:, :half] + x2[:, half:], x1[:, half:] + x2[:, :half]], axis=1)

    up, low = sru[:, :UP_CH], sru[:, UP_CH:]
    conv1x1 = lambda inp, w: jnp.einsum('oc,nchw->nohw', w, inp)
    up_s, low_s = conv1x1(up, w_sq1), conv1x1(low, w_sq2)
    gwc = jax.lax.conv_general_dilated(
        up_s, w_gwc, window_strides=(1, 1), padding='SAME',
        dimension_numbers=('NCHW', 'OIHW', 'NCHW'),
        feature_group_count=GROUP_SIZE) + b_gwc.reshape(1, -1, 1, 1)
    y1 = gwc + conv1x1(up_s, w_pwc1)
    y2 = jnp.concatenate([conv1x1(low_s, w_pwc2), low_s], axis=1)
    out = jnp.concatenate([y1, y2], axis=1)
    att = jax.nn.softmax(out.mean(axis=(2, 3), keepdims=True), axis=1)
    out = att * out
    return out[:, :OP_CHANNEL] + out[:, OP_CHANNEL:]


if __name__ == "__main__":
    N, C, H, W = 2, OP_CHANNEL, 16, 16
    key = jax.random.PRNGKey(0)
    ks = jax.random.split(key, 8)
    gn_w = 1.0 + 0.1 * jax.random.normal(ks[0], (C,), jnp.float32)   # keep sum(weight) away from 0
    gn_b = jnp.zeros((C,), jnp.float32)
    w_sq1 = 0.3 * jax.random.normal(ks[1], (UP_SQ, UP_CH), jnp.float32)
    w_sq2 = 0.3 * jax.random.normal(ks[2], (LOW_SQ, LOW_CH), jnp.float32)
    w_gwc = 0.2 * jax.random.normal(ks[3], (OP_CHANNEL, IN_PER_GROUP, GKS, GKS), jnp.float32)
    b_gwc = 0.1 * jax.random.normal(ks[4], (OP_CHANNEL,), jnp.float32)
    w_pwc1 = 0.3 * jax.random.normal(ks[5], (OP_CHANNEL, UP_SQ), jnp.float32)
    w_pwc2 = 0.3 * jax.random.normal(ks[6], (PWC2_OUT, LOW_SQ), jnp.float32)
    x = jax.random.normal(ks[7], (N, C, H, W), jnp.float32)

    params = (gn_w, gn_b, w_sq1, w_sq2, w_gwc, b_gwc, w_pwc1, w_pwc2)
    out = jax.block_until_ready(scatt_block(x, params))
    ref = jax.block_until_ready(reference(x, params))
    # bf16 MXU operands (f32 accumulation) -> mixed-precision tolerance; with
    # MATMUL_DTYPE = jnp.float32 the kernel matches to ~1e-6.
    tol = 1e-2 if MATMUL_DTYPE == jnp.bfloat16 else 2e-5
    if not bool(jnp.allclose(out, ref, rtol=tol, atol=tol)):
        raise RuntimeError(
            f"mismatch vs reference: max abs err {float(jnp.max(jnp.abs(out - ref)))}")
    print("KERNEL_OK")
</pallas_src>

<mosaic_0001>
module attributes {stable_mosaic.version = 11 : i64} {
  func.func @kernel(%arg0: i32, %arg1: memref<16x256xf32, #tpu.memory_space<vmem>>, %arg2: memref<16x8xf32, #tpu.memory_space<vmem>>, %arg3: memref<9x256xf32, #tpu.memory_space<vmem>>, %arg4: memref<16x16xbf16, #tpu.memory_space<vmem>>, %arg5: memref<4x16xbf16, #tpu.memory_space<vmem>>, %arg6: memref<16x144xbf16, #tpu.memory_space<vmem>>, %arg7: memref<16x4xbf16, #tpu.memory_space<vmem>>, %arg8: memref<16x256xf32, #tpu.memory_space<vmem>>, %arg9: memref<144x256xbf16, #tpu.memory_space<vmem>>) attributes {dimension_semantics = [#tpu.dimension_semantics<parallel>], iteration_bounds = array<i64: 1>, scalar_prefetch = 0 : i64, scratch_operands = 1 : i64, tpu.core_type = #tpu.core_type<tc>, window_params = [{transform_indices = @transform_0, window_bounds = array<i64: 16, 256>}, {pipeline_mode = #tpu.pipeline_mode<synchronous>, transform_indices = @transform_1, window_bounds = array<i64: 16, 8>}, {pipeline_mode = #tpu.pipeline_mode<synchronous>, transform_indices = @transform_2, window_bounds = array<i64: 9, 256>}, {pipeline_mode = #tpu.pipeline_mode<synchronous>, transform_indices = @transform_3, window_bounds = array<i64: 16, 16>}, {pipeline_mode = #tpu.pipeline_mode<synchronous>, transform_indices = @transform_4, window_bounds = array<i64: 4, 16>}, {pipeline_mode = #tpu.pipeline_mode<synchronous>, transform_indices = @transform_5, window_bounds = array<i64: 16, 144>}, {pipeline_mode = #tpu.pipeline_mode<synchronous>, transform_indices = @transform_6, window_bounds = array<i64: 16, 4>}, {transform_indices = @transform_7, window_bounds = array<i64: 16, 256>}]} {
    %c0 = arith.constant 0 : index
    %c0_0 = arith.constant 0 : index
    %0 = vector.load %arg1[%c0, %c0_0] : memref<16x256xf32, #tpu.memory_space<vmem>>, vector<16x256xf32>
    %c0_1 = arith.constant 0 : index
    %c0_2 = arith.constant 0 : index
    %1 = vector.load %arg2[%c0_1, %c0_2] : memref<16x8xf32, #tpu.memory_space<vmem>>, vector<16x8xf32>
    %2 = vector.extract_strided_slice %1 {offsets = [0, 0], sizes = [16, 1], strides = [1, 1]} : vector<16x8xf32> to vector<16x1xf32>
    %3 = vector.extract_strided_slice %1 {offsets = [0, 1], sizes = [16, 1], strides = [1, 1]} : vector<16x8xf32> to vector<16x1xf32>
    %4 = vector.extract_strided_slice %1 {offsets = [0, 2], sizes = [16, 1], strides = [1, 1]} : vector<16x8xf32> to vector<16x1xf32>
    %5 = vector.extract_strided_slice %1 {offsets = [0, 3], sizes = [16, 1], strides = [1, 1]} : vector<16x8xf32> to vector<16x1xf32>
    %6 = vector.extract_strided_slice %1 {offsets = [0, 4], sizes = [16, 1], strides = [1, 1]} : vector<16x8xf32> to vector<16x1xf32>
    %cst = arith.constant 5.000000e-01 : f32
    %7 = vector.broadcast %cst : f32 to vector<16x1xf32>
    %8 = arith.cmpf ogt, %6, %7 : vector<16x1xf32>
    %9 = vector.extract_strided_slice %1 {offsets = [0, 5], sizes = [16, 1], strides = [1, 1]} : vector<16x8xf32> to vector<16x1xf32>
    %cst_3 = arith.constant 5.000000e-01 : f32
    %10 = vector.broadcast %cst_3 : f32 to vector<16x1xf32>
    %11 = arith.cmpf ogt, %9, %10 : vector<16x1xf32>
    %12 = vector.extract_strided_slice %1 {offsets = [0, 6], sizes = [16, 1], strides = [1, 1]} : vector<16x8xf32> to vector<16x1xf32>
    %cst_4 = arith.constant 5.000000e-01 : f32
    %13 = vector.broadcast %cst_4 : f32 to vector<16x1xf32>
    %14 = arith.cmpf ogt, %12, %13 : vector<16x1xf32>
    %cst_5 = arith.constant dense<0.000000e+00> : vector<16xf32>
    %15 = vector.multi_reduction <add>, %0, %cst_5 [1] : vector<16x256xf32> to vector<16xf32>
    %16 = vector.shape_cast %15 : vector<16xf32> to vector<16x1xf32>
    %c15_i32 = arith.constant 15 : i32
    %17 = tpu.dynamic_rotate %16 by %c15_i32 dim 0 : vector<16x1xf32>, i32 -> vector<16x1xf32>
    %c1_i32 = arith.constant 1 : i32
    %18 = tpu.dynamic_rotate %16 by %c1_i32 dim 0 : vector<16x1xf32>, i32 -> vector<16x1xf32>
    %19 = arith.select %14, %17, %18 : vector<16x1xi1>, vector<16x1xf32>
    %20 = arith.addf %16, %19 : vector<16x1xf32>
    %cst_6 = arith.constant 0.001953125 : f32
    %21 = vector.broadcast %cst_6 : f32 to vector<16x1xf32>
    %22 = arith.mulf %20, %21 : vector<16x1xf32>
    %23 = vector.broadcast %22 : vector<16x1xf32> to vector<16x256xf32>
    %24 = arith.subf %0, %23 : vector<16x256xf32>
    %25 = arith.mulf %24, %24 : vector<16x256xf32>
    %cst_7 = arith.constant dense<0.000000e+00> : vector<16xf32>
    %26 = vector.multi_reduction <add>, %25, %cst_7 [1] : vector<16x256xf32> to vector<16xf32>
    %27 = vector.shape_cast %26 : vector<16xf32> to vector<16x1xf32>
    %c15_i32_8 = arith.constant 15 : i32
    %28 = tpu.dynamic_rotate %27 by %c15_i32_8 dim 0 : vector<16x1xf32>, i32 -> vector<16x1xf32>
    %c1_i32_9 = arith.constant 1 : i32
    %29 = tpu.dynamic_rotate %27 by %c1_i32_9 dim 0 : vector<16x1xf32>, i32 -> vector<16x1xf32>
    %30 = arith.select %14, %28, %29 : vector<16x1xi1>, vector<16x1xf32>
    %31 = arith.addf %27, %30 : vector<16x1xf32>
    %cst_10 = arith.constant 0.00195694715 : f32
    %32 = vector.broadcast %cst_10 : f32 to vector<16x1xf32>
    %33 = arith.mulf %31, %32 : vector<16x1xf32>
    %34 = math.sqrt %33 : vector<16x1xf32>
    %cst_11 = arith.constant 1.000000e-10 : f32
    %35 = vector.broadcast %cst_11 : f32 to vector<16x1xf32>
    %36 = arith.addf %34, %35 : vector<16x1xf32>
    %cst_12 = arith.constant 1.000000e+00 : f32
    %37 = vector.broadcast %cst_12 : f32 to vector<16x1xf32>
    %38 = arith.divf %37, %36 : vector<16x1xf32>
    %39 = arith.mulf %38, %2 : vector<16x1xf32>
    %40 = vector.broadcast %39 : vector<16x1xf32> to vector<16x256xf32>
    %41 = arith.mulf %24, %40 : vector<16x256xf32>
    %42 = vector.broadcast %3 : vector<16x1xf32> to vector<16x256xf32>
    %43 = arith.addf %41, %42 : vector<16x256xf32>
    %44 = vector.broadcast %4 : vector<16x1xf32> to vector<16x256xf32>
    %45 = arith.mulf %43, %44 : vector<16x256xf32>
    %46 = arith.negf %45 : vector<16x256xf32>
    %47 = math.exp %46 : vector<16x256xf32>
    %cst_13 = arith.constant 1.000000e+00 : f32
    %48 = vector.broadcast %cst_13 : f32 to vector<16x256xf32>
    %49 = arith.addf %48, %47 : vector<16x256xf32>
    %50 = arith.divf %48, %49 : vector<16x256xf32>
    %cst_14 = arith.constant 5.000000e-01 : f32
    %51 = vector.broadcast %cst_14 : f32 to vector<16x256xf32>
    %52 = arith.cmpf oge, %50, %51 : vector<16x256xf32>
    %cst_15 = arith.constant 0.000000e+00 : f32
    %53 = vector.broadcast %cst_15 : f32 to vector<16x256xf32>
    %54 = arith.select %52, %43, %53 : vector<16x256xi1>, vector<16x256xf32>
    %55 = arith.subf %43, %54 : vector<16x256xf32>
    %c12_i32 = arith.constant 12 : i32
    %56 = tpu.dynamic_rotate %55 by %c12_i32 dim 0 : vector<16x256xf32>, i32 -> vector<16x256xf32>
    %c4_i32 = arith.constant 4 : i32
    %57 = tpu.dynamic_rotate %55 by %c4_i32 dim 0 : vector<16x256xf32>, i32 -> vector<16x256xf32>
    %58 = vector.shape_cast %8 : vector<16x1xi1> to vector<16x1xi1>
    %59 = vector.broadcast %58 : vector<16x1xi1> to vector<16x256xi1>
    %60 = arith.select %59, %56, %57 : vector<16x256xi1>, vector<16x256xf32>
    %61 = arith.addf %54, %60 : vector<16x256xf32>
    %62 = arith.truncf %61 : vector<16x256xf32> to vector<16x256xbf16>
    %c0_16 = arith.constant 0 : index
    %c0_17 = arith.constant 0 : index
    %63 = vector.load %arg4[%c0_16, %c0_17] : memref<16x16xbf16, #tpu.memory_space<vmem>>, vector<16x16xbf16>
    %cst_18 = arith.constant dense<0.000000e+00> : vector<16x256xf32>
    %64 = tpu.matmul %63, %62, %cst_18 {dimension_numbers = #tpu.dot_dimension_numbers<[1], [0], [0], [1], [0, 0, 1, 1], [], []>} : vector<16x16xbf16>, vector<16x256xbf16>, vector<16x256xf32> -> vector<16x256xf32>
    %c0_19 = arith.constant 0 : index
    %c0_20 = arith.constant 0 : index
    %65 = vector.load %arg5[%c0_19, %c0_20] : memref<4x16xbf16, #tpu.memory_space<vmem>>, vector<4x16xbf16>
    %cst_21 = arith.constant dense<0.000000e+00> : vector<4x256xf32>
    %66 = tpu.matmul %65, %62, %cst_21 {dimension_numbers = #tpu.dot_dimension_numbers<[1], [0], [0], [1], [0, 0, 1, 1], [], []>} : vector<4x16xbf16>, vector<16x256xbf16>, vector<4x256xf32> -> vector<4x256xf32>
    %c0_22 = arith.constant 0 : index
    %c0_23 = arith.constant 0 : index
    %67 = vector.load %arg3[%c0_22, %c0_23] : memref<9x256xf32, #tpu.memory_space<vmem>>, vector<9x256xf32>
    %c17_i32 = arith.constant 17 : i32
    %68 = tpu.dynamic_rotate %64 by %c17_i32 dim 1 : vector<16x256xf32>, i32 -> vector<16x256xf32>
    %69 = vector.extract_strided_slice %67 {offsets = [0, 0], sizes = [1, 256], strides = [1, 1]} : vector<9x256xf32> to vector<1x256xf32>
    %70 = vector.broadcast %69 : vector<1x256xf32> to vector<16x256xf32>
    %71 = arith.mulf %68, %70 : vector<16x256xf32>
    %72 = arith.truncf %71 : vector<16x256xf32> to vector<16x256xbf16>
    %c0_24 = arith.constant 0 : index
    %c0_25 = arith.constant 0 : index
    %73 = vector.load %arg9[%c0_24, %c0_25] : memref<144x256xbf16, #tpu.memory_space<vmem>>, vector<16x256xbf16>
    tpu.vector_store %arg9[%c0_24, %c0_25], %72 {strides = array<i32>} : memref<144x256xbf16, #tpu.memory_space<vmem>>, vector<16x256xbf16>,
    %c16_i32 = arith.constant 16 : i32
    %74 = tpu.dynamic_rotate %64 by %c16_i32 dim 1 : vector<16x256xf32>, i32 -> vector<16x256xf32>
    %75 = vector.extract_strided_slice %67 {offsets = [1, 0], sizes = [1, 256], strides = [1, 1]} : vector<9x256xf32> to vector<1x256xf32>
    %76 = vector.broadcast %75 : vector<1x256xf32> to vector<16x256xf32>
    %77 = arith.mulf %74, %76 : vector<16x256xf32>
    %78 = arith.truncf %77 : vector<16x256xf32> to vector<16x256xbf16>
    %c16 = arith.constant 16 : index
    %c0_26 = arith.constant 0 : index
    %79 = vector.load %arg9[%c16, %c0_26] : memref<144x256xbf16, #tpu.memory_space<vmem>>, vector<16x256xbf16>
    tpu.vector_store %arg9[%c16, %c0_26], %78 {strides = array<i32>} : memref<144x256xbf16, #tpu.memory_space<vmem>>, vector<16x256xbf16>,
    %c15_i32_27 = arith.constant 15 : i32
    %80 = tpu.dynamic_rotate %64 by %c15_i32_27 dim 1 : vector<16x256xf32>, i32 -> vector<16x256xf32>
    %81 = vector.extract_strided_slice %67 {offsets = [2, 0], sizes = [1, 256], strides = [1, 1]} : vector<9x256xf32> to vector<1x256xf32>
    %82 = vector.broadcast %81 : vector<1x256xf32> to vector<16x256xf32>
    %83 = arith.mulf %80, %82 : vector<16x256xf32>
    %84 = arith.truncf %83 : vector<16x256xf32> to vector<16x256xbf16>
    %c32 = arith.constant 32 : index
    %c0_28 = arith.constant 0 : index
    %85 = vector.load %arg9[%c32, %c0_28] : memref<144x256xbf16, #tpu.memory_space<vmem>>, vector<16x256xbf16>
    tpu.vector_store %arg9[%c32, %c0_28], %84 {strides = array<i32>} : memref<144x256xbf16, #tpu.memory_space<vmem>>, vector<16x256xbf16>,
    %c1_i32_29 = arith.constant 1 : i32
    %86 = tpu.dynamic_rotate %64 by %c1_i32_29 dim 1 : vector<16x256xf32>, i32 -> vector<16x256xf32>
    %87 = vector.extract_strided_slice %67 {offsets = [3, 0], sizes = [1, 256], strides = [1, 1]} : vector<9x256xf32> to vector<1x256xf32>
    %88 = vector.broadcast %87 : vector<1x256xf32> to vector<16x256xf32>
    %89 = arith.mulf %86, %88 : vector<16x256xf32>
    %90 = arith.truncf %89 : vector<16x256xf32> to vector<16x256xbf16>
    %c48 = arith.constant 48 : index
    %c0_30 = arith.constant 0 : index
    %91 = vector.load %arg9[%c48, %c0_30] : memref<144x256xbf16, #tpu.memory_space<vmem>>, vector<16x256xbf16>
    tpu.vector_store %arg9[%c48, %c0_30], %90 {strides = array<i32>} : memref<144x256xbf16, #tpu.memory_space<vmem>>, vector<16x256xbf16>,
    %92 = arith.truncf %64 : vector<16x256xf32> to vector<16x256xbf16>
    %c64 = arith.constant 64 : index
    %c0_31 = arith.constant 0 : index
    %93 = vector.load %arg9[%c64, %c0_31] : memref<144x256xbf16, #tpu.memory_space<vmem>>, vector<16x256xbf16>
    tpu.vector_store %arg9[%c64, %c0_31], %92 {strides = array<i32>} : memref<144x256xbf16, #tpu.memory_space<vmem>>, vector<16x256xbf16>,
    %c255_i32 = arith.constant 255 : i32
    %94 = tpu.dynamic_rotate %64 by %c255_i32 dim 1 : vector<16x256xf32>, i32 -> vector<16x256xf32>
    %95 = vector.extract_strided_slice %67 {offsets = [5, 0], sizes = [1, 256], strides = [1, 1]} : vector<9x256xf32> to vector<1x256xf32>
    %96 = vector.broadcast %95 : vector<1x256xf32> to vector<16x256xf32>
    %97 = arith.mulf %94, %96 : vector<16x256xf32>
    %98 = arith.truncf %97 : vector<16x256xf32> to vector<16x256xbf16>
    %c80 = arith.constant 80 : index
    %c0_32 = arith.constant 0 : index
    %99 = vector.load %arg9[%c80, %c0_32] : memref<144x256xbf16, #tpu.memory_space<vmem>>, vector<16x256xbf16>
    tpu.vector_store %arg9[%c80, %c0_32], %98 {strides = array<i32>} : memref<144x256xbf16, #tpu.memory_space<vmem>>, vector<16x256xbf16>,
    %c241_i32 = arith.constant 241 : i32
    %100 = tpu.dynamic_rotate %64 by %c241_i32 dim 1 : vector<16x256xf32>, i32 -> vector<16x256xf32>
    %101 = vector.extract_strided_slice %67 {offsets = [6, 0], sizes = [1, 256], strides = [1, 1]} : vector<9x256xf32> to vector<1x256xf32>
    %102 = vector.broadcast %101 : vector<1x256xf32> to vector<16x256xf32>
    %103 = arith.mulf %100, %102 : vector<16x256xf32>
    %104 = arith.truncf %103 : vector<16x256xf32> to vector<16x256xbf16>
    %c96 = arith.constant 96 : index
    %c0_33 = arith.constant 0 : index
    %105 = vector.load %arg9[%c96, %c0_33] : memref<144x256xbf16, #tpu.memory_space<vmem>>, vector<16x256xbf16>
    tpu.vector_store %arg9[%c96, %c0_33], %104 {strides = array<i32>} : memref<144x256xbf16, #tpu.memory_space<vmem>>, vector<16x256xbf16>,
    %c240_i32 = arith.constant 240 : i32
    %106 = tpu.dynamic_rotate %64 by %c240_i32 dim 1 : vector<16x256xf32>, i32 -> vector<16x256xf32>
    %107 = vector.extract_strided_slice %67 {offsets = [7, 0], sizes = [1, 256], strides = [1, 1]} : vector<9x256xf32> to vector<1x256xf32>
    %108 = vector.broadcast %107 : vector<1x256xf32> to vector<16x256xf32>
    %109 = arith.mulf %106, %108 : vector<16x256xf32>
    %110 = arith.truncf %109 : vector<16x256xf32> to vector<16x256xbf16>
    %c112 = arith.constant 112 : index
    %c0_34 = arith.constant 0 : index
    %111 = vector.load %arg9[%c112, %c0_34] : memref<144x256xbf16, #tpu.memory_space<vmem>>, vector<16x256xbf16>
    tpu.vector_store %arg9[%c112, %c0_34], %110 {strides = array<i32>} : memref<144x256xbf16, #tpu.memory_space<vmem>>, vector<16x256xbf16>,
    %c239_i32 = arith.constant 239 : i32
    %112 = tpu.dynamic_rotate %64 by %c239_i32 dim 1 : vector<16x256xf32>, i32 -> vector<16x256xf32>
    %113 = vector.extract_strided_slice %67 {offsets = [8, 0], sizes = [1, 256], strides = [1, 1]} : vector<9x256xf32> to vector<1x256xf32>
    %114 = vector.broadcast %113 : vector<1x256xf32> to vector<16x256xf32>
    %115 = arith.mulf %112, %114 : vector<16x256xf32>
    %116 = arith.truncf %115 : vector<16x256xf32> to vector<16x256xbf16>
    %c128 = arith.constant 128 : index
    %c0_35 = arith.constant 0 : index
    %117 = vector.load %arg9[%c128, %c0_35] : memref<144x256xbf16, #tpu.memory_space<vmem>>, vector<16x256xbf16>
    tpu.vector_store %arg9[%c128, %c0_35], %116 {strides = array<i32>} : memref<144x256xbf16, #tpu.memory_space<vmem>>, vector<16x256xbf16>,
    %c0_36 = arith.constant 0 : index
    %c0_37 = arith.constant 0 : index
    %118 = vector.load %arg6[%c0_36, %c0_37] : memref<16x144xbf16, #tpu.memory_space<vmem>>, vector<16x144xbf16>
    %c0_38 = arith.constant 0 : index
    %c0_39 = arith.constant 0 : index
    %119 = vector.load %arg9[%c0_38, %c0_39] : memref<144x256xbf16, #tpu.memory_space<vmem>>, vector<144x256xbf16>
    %cst_40 = arith.constant dense<0.000000e+00> : vector<16x256xf32>
    %120 = tpu.matmul %118, %119, %cst_40 {dimension_numbers = #tpu.dot_dimension_numbers<[1], [0], [0], [1], [0, 0, 1, 1], [], []>} : vector<16x144xbf16>, vector<144x256xbf16>, vector<16x256xf32> -> vector<16x256xf32>
    %121 = vector.broadcast %5 : vector<16x1xf32> to vector<16x256xf32>
    %122 = arith.addf %120, %121 : vector<16x256xf32>
    %c0_41 = arith.constant 0 : index
    %c0_42 = arith.constant 0 : index
    %123 = vector.load %arg7[%c0_41, %c0_42] : memref<16x4xbf16, #tpu.memory_space<vmem>>, vector<16x4xbf16>
    %124 = arith.truncf %66 : vector<4x256xf32> to vector<4x256xbf16>
    %cst_43 = arith.constant dense<0.000000e+00> : vector<16x256xf32>
    %125 = tpu.matmul %123, %124, %cst_43 {dimension_numbers = #tpu.dot_dimension_numbers<[1], [0], [0], [1], [0, 0, 1, 1], [], []>} : vector<16x4xbf16>, vector<4x256xbf16>, vector<16x256xf32> -> vector<16x256xf32>
    %cst_44 = arith.constant dense<0.000000e+00> : vector<16xf32>
    %126 = vector.multi_reduction <add>, %122, %cst_44 [1] : vector<16x256xf32> to vector<16xf32>
    %127 = vector.shape_cast %126 : vector<16xf32> to vector<16x1xf32>
    %cst_45 = arith.constant 2.560000e+02 : f32
    %128 = vector.broadcast %cst_45 : f32 to vector<16x1xf32>
    %129 = arith.divf %127, %128 : vector<16x1xf32>
    %cst_46 = arith.constant dense<0.000000e+00> : vector<16xf32>
    %130 = vector.multi_reduction <add>, %125, %cst_46 [1] : vector<16x256xf32> to vector<16xf32>
    %131 = vector.shape_cast %130 : vector<16xf32> to vector<16x1xf32>
    %cst_47 = arith.constant 2.560000e+02 : f32
    %132 = vector.broadcast %cst_47 : f32 to vector<16x1xf32>
    %133 = arith.divf %131, %132 : vector<16x1xf32>
    %134 = arith.maximumf %129, %133 : vector<16x1xf32>
    %cst_48 = arith.constant dense<0xFF800000> : vector<1xf32>
    %135 = vector.multi_reduction <maximumf>, %134, %cst_48 [0] : vector<16x1xf32> to vector<1xf32>
    %136 = vector.shape_cast %135 : vector<1xf32> to vector<1x1xf32>
    %137 = vector.broadcast %136 : vector<1x1xf32> to vector<16x1xf32>
    %138 = arith.subf %129, %137 : vector<16x1xf32>
    %139 = math.exp %138 : vector<16x1xf32>
    %140 = vector.broadcast %136 : vector<1x1xf32> to vector<16x1xf32>
    %141 = arith.subf %133, %140 : vector<16x1xf32>
    %142 = math.exp %141 : vector<16x1xf32>
    %143 = arith.addf %139, %142 : vector<16x1xf32>
    %c12_i32_49 = arith.constant 12 : i32
    %144 = tpu.dynamic_rotate %143 by %c12_i32_49 dim 0 : vector<16x1xf32>, i32 -> vector<16x1xf32>
    %c4_i32_50 = arith.constant 4 : i32
    %145 = tpu.dynamic_rotate %143 by %c4_i32_50 dim 0 : vector<16x1xf32>, i32 -> vector<16x1xf32>
    %146 = arith.select %8, %144, %145 : vector<16x1xi1>, vector<16x1xf32>
    %147 = arith.addf %143, %146 : vector<16x1xf32>
    %c14_i32 = arith.constant 14 : i32
    %148 = tpu.dynamic_rotate %147 by %c14_i32 dim 0 : vector<16x1xf32>, i32 -> vector<16x1xf32>
    %c2_i32 = arith.constant 2 : i32
    %149 = tpu.dynamic_rotate %147 by %c2_i32 dim 0 : vector<16x1xf32>, i32 -> vector<16x1xf32>
    %150 = arith.select %11, %148, %149 : vector<16x1xi1>, vector<16x1xf32>
    %151 = arith.addf %147, %150 : vector<16x1xf32>
    %c15_i32_51 = arith.constant 15 : i32
    %152 = tpu.dynamic_rotate %151 by %c15_i32_51 dim 0 : vector<16x1xf32>, i32 -> vector<16x1xf32>
    %c1_i32_52 = arith.constant 1 : i32
    %153 = tpu.dynamic_rotate %151 by %c1_i32_52 dim 0 : vector<16x1xf32>, i32 -> vector<16x1xf32>
    %154 = arith.select %14, %152, %153 : vector<16x1xi1>, vector<16x1xf32>
    %155 = arith.addf %151, %154 : vector<16x1xf32>
    %156 = tpu.reciprocal %155 : vector<16x1xf32> -> vector<16x1xf32>
    %157 = arith.mulf %139, %156 : vector<16x1xf32>
    %158 = vector.broadcast %157 : vector<16x1xf32> to vector<16x256xf32>
    %159 = arith.mulf %122, %158 : vector<16x256xf32>
    %160 = arith.mulf %142, %156 : vector<16x1xf32>
    %161 = vector.broadcast %160 : vector<16x1xf32> to vector<16x256xf32>
    %162 = arith.mulf %125, %161 : vector<16x256xf32>
    %163 = arith.addf %159, %162 : vector<16x256xf32>
    %c0_53 = arith.constant 0 : index
    %c0_54 = arith.constant 0 : index
    %164 = vector.load %arg8[%c0_53, %c0_54] : memref<16x256xf32, #tpu.memory_space<vmem>>, vector<16x256xf32>
    tpu.vector_store %arg8[%c0_53, %c0_54], %163 {strides = array<i32>} : memref<16x256xf32, #tpu.memory_space<vmem>>, vector<16x256xf32>,
    return
  }
  func.func @transform_0(%arg0: i32) -> (i32, i32) {
    %c0_i32 = arith.constant 0 : i32
    %c0_i32_0 = arith.constant 0 : i32
    return %arg0, %c0_i32 : i32, i32
  }
  func.func @transform_1(%arg0: i32) -> (i32, i32) {
    %c0_i32 = arith.constant 0 : i32
    %c0_i32_0 = arith.constant 0 : i32
    %c0_i32_1 = arith.constant 0 : i32
    return %c0_i32, %c0_i32_0 : i32, i32
  }
  func.func @transform_2(%arg0: i32) -> (i32, i32) {
    %c0_i32 = arith.constant 0 : i32
    %c0_i32_0 = arith.constant 0 : i32
    %c0_i32_1 = arith.constant 0 : i32
    return %c0_i32, %c0_i32_0 : i32, i32
  }
  func.func @transform_3(%arg0: i32) -> (i32, i32) {
    %c0_i32 = arith.constant 0 : i32
    %c0_i32_0 = arith.constant 0 : i32
    %c0_i32_1 = arith.constant 0 : i32
    return %c0_i32, %c0_i32_0 : i32, i32
  }
  func.func @transform_4(%arg0: i32) -> (i32, i32) {
    %c0_i32 = arith.constant 0 : i32
    %c0_i32_0 = arith.constant 0 : i32
    %c0_i32_1 = arith.constant 0 : i32
    return %c0_i32, %c0_i32_0 : i32, i32
  }
  func.func @transform_5(%arg0: i32) -> (i32, i32) {
    %c0_i32 = arith.constant 0 : i32
    %c0_i32_0 = arith.constant 0 : i32
    %c0_i32_1 = arith.constant 0 : i32
    return %c0_i32, %c0_i32_0 : i32, i32
  }
  func.func @transform_6(%arg0: i32) -> (i32, i32) {
    %c0_i32 = arith.constant 0 : i32
    %c0_i32_0 = arith.constant 0 : i32
    %c0_i32_1 = arith.constant 0 : i32
    return %c0_i32, %c0_i32_0 : i32, i32
  }
  func.func @transform_7(%arg0: i32) -> (i32, i32) {
    %c0_i32 = arith.constant 0 : i32
    %c0_i32_0 = arith.constant 0 : i32
    return %arg0, %c0_i32 : i32, i32
  }
}

</mosaic_0001>

<bundles_post_ra>
// kernel: tpu_custom_call.1
= control target key start
LH: loop header
LB: loop body
LE: loop exit
PB: predicated region body
PF: predicated region fallthrough
CT: control target
= control target key end

     0   :  { %12 = vsyncpa [#allocation4], 0  ;;  %s1718_s0 = inlined_call_operand.vmem [shape: f32[16,256], index: 0, kind: input, shape index: {}]   ;;  %s1719_s1 = inlined_call_operand.vmem [shape: f32[16,8], index: 1, kind: input, shape index: {}]   ;;  %s1720_s2 = inlined_call_operand.hbm [shape: f32[9,256], index: 2, kind: input, shape index: {}]   ;;  %s1721_s3 = inlined_call_operand.hbm [shape: bf16[16,16], index: 3, kind: input, shape index: {}]   ;;  %s1722_s4 = inlined_call_operand.hbm [shape: bf16[4,16], index: 4, kind: input, shape index: {}]   ;;  %s1723_s5 = inlined_call_operand.vmem [shape: bf16[16,144], index: 5, kind: input, shape index: {}]   ;;  %s1724_s6 = inlined_call_operand.vmem [shape: bf16[16,4], index: 6, kind: input, shape index: {}]   ;;  %s1725_s7 = inlined_call_operand.hbm [shape: f32[16,256], index: 7, kind: output, shape index: {}]  }
   0x1   :  { %13 = vsyncpa [#allocation7], 0 }
   0x2   :  { %14 = vsyncpa [#allocation5], 0  ;;  %s1182_s24 = smov [#allocation6]   ;;  %s1088_s28 = scalar_lea.hbm %s1721_s3, 128 }
   0x3   :  { %s36_s25 = sshll.u32 %s1182_s24, 4  ;;  %p1089_p0 = scmp.ne.s32.totalorder %s1721_s3, %s1088_s28  ;;  %s37_s25 = int_to_ptr.vmem [resolvable:$true] %s36_s25 }
   0x4   :  { %p1092_p1 = scmp.lt.u32.totalorder %s1088_s28, %s1721_s3 }
   0x6   :  { %p1094_p2 = pnand %p1092_p1, %p1089_p0 }
   0x8   :  { %1097 = shalt.err (!%p1094_p2)
}
   0x9   :  { %s1098_s10 = scalar_lea.vmem %s37_s25, 128  ;;  %p1103_p4 = scmp.lt.s32.totalorder %s37_s25, %s37_s25 }
   0xa   :  { %p1099_p3 = scmp.ne.s32.totalorder %s37_s25, %s1098_s10  ;;  %p1104_p5 = scmp.lt.s32.totalorder %s1098_s10, %s1098_s10 }
   0xc   :  { %p1105_p6 = por %p1104_p5, %p1103_p4 }
   0xe   :  { %p1106_p7 = pnand %p1105_p6, %p1099_p3 }
  0x10   :  { %1109 = shalt.err (!%p1106_p7)
}
  0x11   :  { %s1183_s11 = smov 64   ;;  %s1184_s12 = smov 4  }
  0x12   :  { %42 = dma.hbm_to_vmem [thread:$0]  %s1721_s3, 128, %s37_s25, [#allocation7], %s1183_s11, %s1183_s11, %s1184_s12  }
  0x13   :  { %s1185_s15 = smov [#allocation3]   ;;  %s1110_s19 = scalar_lea.hbm %s1720_s2, 512 }
  0x14   :  { %s24_s16 = sshll.u32 %s1185_s15, 4  ;;  %p1111_p8 = scmp.ne.s32.totalorder %s1720_s2, %s1110_s19  ;;  %s25_s16 = int_to_ptr.vmem [resolvable:$true] %s24_s16 }
  0x15   :  { %p1114_p9 = scmp.lt.u32.totalorder %s1110_s19, %s1720_s2 }
  0x17   :  { %p1116_p10 = pnand %p1114_p9, %p1111_p8 }
  0x19   :  { %1119 = shalt.err (!%p1116_p10)
}
  0x1a   :  { %s1120_s24 = scalar_lea.vmem %s25_s16, 512  ;;  %p1125_p12 = scmp.lt.s32.totalorder %s25_s16, %s25_s16 }
  0x1b   :  { %p1121_p11 = scmp.ne.s32.totalorder %s25_s16, %s1120_s24  ;;  %p1126_p13 = scmp.lt.s32.totalorder %s1120_s24, %s1120_s24 }
  0x1d   :  { %p1127_p0 = por %p1126_p13, %p1125_p12 }
  0x1f   :  { %p1128_p1 = pnand %p1127_p0, %p1121_p11 }
  0x21   :  { %1131 = shalt.err (!%p1128_p1)
}
  0x22   :  { %s1186_s3 = smov 256   ;;  %s1187_s25 = smov 16  }
  0x23   :  { %30 = dma.hbm_to_vmem [thread:$0]  %s1720_s2, 512, %s25_s16, [#allocation4], %s1186_s3, %s1186_s3, %s1187_s25  }
  0x24   :  { %s1188_s28 = smov [#allocation8]   ;;  %s1132_s9 = scalar_lea.hbm %s1722_s4, 32 }
  0x25   :  { %s49_s29 = sshll.u32 %s1188_s28, 4  ;;  %p1133_p2 = scmp.ne.s32.totalorder %s1722_s4, %s1132_s9  ;;  %s50_s29 = int_to_ptr.vmem [resolvable:$true] %s49_s29 }
  0x26   :  { %p1136_p3 = scmp.lt.u32.totalorder %s1132_s9, %s1722_s4 }
  0x28   :  { %p1138_p4 = pnand %p1136_p3, %p1133_p2 }
  0x2a   :  { %1141 = shalt.err (!%p1138_p4)
}
  0x2b   :  { %s1142_s15 = scalar_lea.vmem %s50_s29, 32  ;;  %p1147_p6 = scmp.lt.s32.totalorder %s50_s29, %s50_s29 }
  0x2c   :  { %p1143_p5 = scmp.ne.s32.totalorder %s50_s29, %s1142_s15  ;;  %p1148_p7 = scmp.lt.s32.totalorder %s1142_s15, %s1142_s15 }
  0x2e   :  { %p1149_p8 = por %p1148_p7, %p1147_p6 }
  0x30   :  { %p1150_p9 = pnand %p1149_p8, %p1143_p5 }
  0x32   :  { %1153 = shalt.err (!%p1150_p9)
}
  0x33   :  { %52 = dma.hbm_to_vmem [thread:$0]  %s1722_s4, 32, %s50_s29, [#allocation7]  }
  0x34   :  { %1176 = dma.done.wait [#allocation4], 512  }
  0x35   :  { %1177 = vsyncadd [#allocation4], 4294966784 }
  0x36   :  { %1178 = dma.done.wait [#allocation7], 160  }
  0x37   :  { %1179 = vsyncadd [#allocation7], 4294967136  ;;  %v67_v0 = vld [vmem:[%s1718_s0] sm:$0xff]  ;;  %v68_v1 = vld [vmem:[%s1718_s0 + $0x8] sm:$0xff]  ;;  %v83_v6 = vlaneseq  ;;  %v1189_v7 = vmov 6   ;;  %v1191_v51 = vmov 1  }
  0x38   :  { %v69_v2 = vld [vmem:[%s1718_s0 + $0x10] sm:$0xff]  ;;  %v75_v3 = vadd.f32 %v68_v1, %v67_v0  ;;  %v70_v4 = vld [vmem:[%s1718_s0 + $0x18] sm:$0xff]  ;;  %1035 = vset.pattern.permute.xlu1 %v1189_v7  ;;  %1038 = vset.pattern.permute.xlu0 %v1189_v7  ;;  %s1190_s0 = smov 6   ;;  %v1321_v19 = vld [vmem:[%s1719_s1] sm:$0xff]  ;;  %v1192_v54 = vmov 0   ;;  %vm309_vm15 = vcmask 130048  }
  0x39   :  { %v78_v5 = vadd.f32 %v70_v4, %v69_v2  ;;  %v1302_v9 = vshrl.u32 %v83_v6, 7  ;;  %vm73_vm2 = vcmp.gt.f32.partialorder %v1321_v19, 0.5  ;;  %v1329_v24 = vld [vmem:[%s1719_s1 + $0x8] sm:$0xff]  ;;  %345 = vmatprep.mubr.bf16.mxu1 %v1192_v54  ;;  %s1195_s1 = smov 17   ;;  %s1196_s29 = smov 15  }
  0x3a   :  { %76 = vadd.xlane.f32.xlu0 %v75_v3  ;;  %vm74_vm3 = vcmp.gt.f32.partialorder %v1329_v24, 0.5  ;;  %s1197_s30 = smov 1   ;;  %s1198_s8 = smov 127  }
  0x3b   :  { %vm90_vm0 = vcmp.lt.s32.totalorder %v1302_v9, 1  ;;  %vm85_vm1 = vcmp.lt.s32.totalorder %v1302_v9, 7  ;;  %vm277_vm12 = vcmp.lt.s32.totalorder %v1302_v9, 4  ;;  %s1199_s9 = smov 113   ;;  %s1200_s10 = smov 112  }
  0x3c   :  { %s1201_s11 = smov 111   ;;  %s1205_s17 = smov 126  }
  0x3d   :  { %s1206_s18 = smov [#allocation9]  }
  0x3e   :  { %79 = vadd.xlane.f32.xlu0 %v78_v5  ;;  %s982_s19 = sshll.u32 %s1206_s18, 4  ;;  %s983_s19 = int_to_ptr.vmem [resolvable:$true] %s982_s19 }
  0x3f   :  { %s1154_s20 = scalar_lea.vmem %s983_s19, 512  ;;  %p1159_p11 = scmp.lt.s32.totalorder %s983_s19, %s983_s19 }
  0x40   :  { %p1155_p10 = scmp.ne.s32.totalorder %s983_s19, %s1154_s20  ;;  %p1160_p12 = scmp.lt.s32.totalorder %s1154_s20, %s1154_s20 }
  0x42   :  { %p1161_p13 = por %p1160_p12, %p1159_p11 }
  0x44   :  { %p1162_p0 = pnand %p1161_p13, %p1155_p10 }
  0xc7   :  { %v77_v8 = vpop.xlane.xlu0 %76 }
  0xc8   :  { %v81_v11 = vrot.slane %v77_v8, 1  ;;  %v88_v12 = vrot.slane %v77_v8, 7 }
  0xcb   :  { %v80_v10 = vpop.xlane.xlu0 %79 }
  0xcc   :  { %v82_v13 = vrot.slane %v80_v10, 1  ;;  %v89_v14 = vrot.slane %v80_v10, 7 }
  0xce   :  { %v92_v15 = vsel %vm90_vm0, %v89_v14, %v88_v12  ;;  %v86_v16 = vsel %vm85_vm1, %v81_v11, %v82_v13  ;;  %v87_v17 = vsel %vm85_vm1, %v82_v13, %v81_v11  ;;  %v91_v18 = vsel %vm90_vm0, %v88_v12, %v89_v14 }
  0xcf   :  { %103 = vrot.lane.b32.xlu0 %v92_v15, %s1190_s0  ;;  %95 = vrot.lane.b32.xlu1 %v86_v16, %s1190_s0 }
  0xd3   :  { %97 = vrot.lane.b32.xlu1 %v87_v17, %s1190_s0 }
  0xd7   :  { %105 = vrot.lane.b32.xlu1 %v91_v18, %s1190_s0 }
 0x141   :  { %v104_v20 = vpop.permute.xlu0 %103  ;;  %v96_v21 = vpop.permute.xlu1 %95 }
 0x142   :  { %v109_v22 = vsel %vm73_vm2, %v96_v21, %v104_v20 }
 0x143   :  { %v111_v23 = vadd.f32 %v109_v22, %v77_v8  ;;  %v1193_v22 = vmov 2  }
 0x145   :  { %v113_v25 = vmul.f32 0.001953125, %v111_v23  ;;  %v98_v26 = vpop.permute.xlu1 %97  ;;  %v282_v23 = vsel %vm73_vm2, 1, %v1192_v54 }
 0x147   :  { %117 = vperm.xlu1 %1035, %v113_v25   ;;  %v1194_v25 = vmov 4  }
 0x149   :  { %v106_v27 = vpop.permute.xlu1 %105 }
 0x14a   :  { %v110_v28 = vsel %vm74_vm3, %v98_v26, %v106_v27  ;;  %v283_v26 = vsel %vm74_vm3, 1, %v1192_v54 }
 0x14b   :  { %v112_v29 = vadd.f32 %v110_v28, %v80_v10 }
 0x14d   :  { %v114_v30 = vmul.f32 0.001953125, %v112_v29 }
 0x14f   :  { %122 = vperm.xlu1 %1035, %v114_v30  }
 0x153   :  { %1036 = vset.pattern.permute.xlu1 %v1191_v51 }
 0x1c6   :  { %v118_v31 = vpop.permute.xlu1 %117 }
 0x1c7   :  { %v1334_v32 = vsub.f32 %v67_v0, %v118_v31  ;;  %v1336_v33 = vsub.f32 %v68_v1, %v118_v31 }
 0x1c9   :  { %v129_v34 = vmul.f32 %v1334_v32, %v1334_v32  ;;  %v130_v35 = vmul.f32 %v1336_v33, %v1336_v33 }
 0x1cb   :  { %v133_v36 = vadd.f32 %v130_v35, %v129_v34 }
 0x1cd   :  { %134 = vadd.xlane.f32.xlu1 %v133_v36 }
 0x1ce   :  { %v123_v37 = vpop.permute.xlu1 %122 }
 0x1cf   :  { %v1342_v38 = vsub.f32 %v69_v2, %v123_v37  ;;  %v1344_v39 = vsub.f32 %v70_v4, %v123_v37 }
 0x1d1   :  { %v131_v40 = vmul.f32 %v1342_v38, %v1342_v38  ;;  %v132_v41 = vmul.f32 %v1344_v39, %v1344_v39 }
 0x1d3   :  { %v136_v42 = vadd.f32 %v132_v41, %v131_v40 }
 0x1d5   :  { %137 = vadd.xlane.f32.xlu0 %v136_v42 }
 0x25a   :  { %v135_v43 = vpop.xlane.xlu1 %134 }
 0x25b   :  { %v139_v45 = vrot.slane %v135_v43, 1  ;;  %v143_v50 = vrot.slane %v135_v43, 7 }
 0x262   :  { %v138_v44 = vpop.xlane.xlu0 %137 }
 0x263   :  { %v140_v46 = vrot.slane %v138_v44, 1  ;;  %v144_v47 = vrot.slane %v138_v44, 7 }
 0x265   :  { %v142_v48 = vsel %vm85_vm1, %v140_v46, %v139_v45  ;;  %v141_v49 = vsel %vm85_vm1, %v139_v45, %v140_v46  ;;  %v146_v52 = vsel %vm90_vm0, %v144_v47, %v143_v50  ;;  %v145_v53 = vsel %vm90_vm0, %v143_v50, %v144_v47 }
 0x266   :  { %151 = vrot.lane.b32.xlu0 %v142_v48, %s1190_s0  ;;  %149 = vrot.lane.b32.xlu1 %v141_v49, %s1190_s0 }
 0x26a   :  { %157 = vrot.lane.b32.xlu1 %v146_v52, %s1190_s0  ;;  %193 = vrot.lane.b32.xlu0 %v1329_v24, %s1190_s0 }
 0x26e   :  { %159 = vrot.lane.b32.xlu1 %v145_v53, %s1190_s0 }
 0x272   :  { %191 = vrot.lane.b32.xlu1 %v1321_v19, %s1190_s0 }
 0x276   :  { %214 = vperm.xlu1 %1036, %v1321_v19  }
 0x27a   :  { %218 = vperm.xlu1 %1036, %v1329_v24  }
 0x27e   :  { %1037 = vset.pattern.permute.xlu1 %v1189_v7 }
 0x2d8   :  { %v150_v55 = vpop.permute.xlu1 %149  ;;  %v152_v59 = vpop.permute.xlu0 %151 }
 0x2dc   :  { %v158_v56 = vpop.permute.xlu1 %157  ;;  %v194_v18 = vpop.permute.xlu0 %193 }
 0x2dd   :  { %v163_v57 = vsel %vm73_vm2, %v150_v55, %v158_v56 }
 0x2de   :  { %v165_v58 = vadd.f32 %v163_v57, %v135_v43 }
 0x2e0   :  { %v167_v60 = vmul.f32 0.0019569471, %v165_v58  ;;  %v160_v61 = vpop.permute.xlu1 %159 }
 0x2e1   :  { %v164_v62 = vsel %vm74_vm3, %v152_v59, %v160_v61 }
 0x2e2   :  { %1052 = vrsqrt.f32 %v167_v60  ;;  %v166_v63 = vadd.f32 %v164_v62, %v138_v44  ;;  %vm171_vm4 = vcmp.eq.f32.partialorder %v167_v60, inf  ;;  %v174_v3 = vand.u32 2147483648, %v167_v60 }
 0x2e3   :  { %vm173_vm5 = vcmp.eq.f32.partialorder %v167_v60, 0.0 }
 0x2e4   :  { %v168_v0 = vmul.f32 0.0019569471, %v166_v63  ;;  %v192_v15 = vpop.permute.xlu1 %191 }
 0x2e6   :  { %1054 = vrsqrt.f32 %v168_v0  ;;  %vm178_vm6 = vcmp.eq.f32.partialorder %v168_v0, inf  ;;  %v181_v11 = vand.u32 2147483648, %v168_v0  ;;  %vm180_vm7 = vcmp.eq.f32.partialorder %v168_v0, 0.0 }
 0x2ec   :  { %v1053_v1 = vpop.eup %1052 }
 0x2ed   :  { %v170_v2 = vmul.f32 %v1053_v1, %v167_v60 }
 0x2ef   :  { %v172_v4 = vsel %vm171_vm4, %v167_v60, %v170_v2  ;;  %vm739_vm4 = vcmask 1041408  }
 0x2f0   :  { %v1055_v5 = vpop.eup %1054  ;;  %v175_v7 = vsel %vm173_vm5, %v174_v3, %v172_v4  ;;  %vm735_vm5 = vcmask 31744  }
 0x2f1   :  { %v183_v8 = vadd.f32 1e-10, %v175_v7  ;;  %v177_v10 = vmul.f32 %v1055_v5, %v168_v0 }
 0x2f3   :  { %1056 = vrcp.f32 %v183_v8  ;;  %v179_v12 = vsel %vm178_vm6, %v168_v0, %v177_v10 }
 0x2f4   :  { %v182_v13 = vsel %vm180_vm7, %v181_v11, %v179_v12 }
 0x2f5   :  { %v184_v14 = vadd.f32 1e-10, %v182_v13  ;;  %v215_v27 = vpop.permute.xlu1 %214 }
 0x2f7   :  { %1058 = vrcp.f32 %v184_v14 }
 0x2f9   :  { %v219_v28 = vpop.permute.xlu1 %218 }
 0x2fd   :  { %v1057_v16 = vpop.eup %1056 }
 0x2fe   :  { %v197_v17 = vmul.f32 %v1057_v16, %v192_v15 }
 0x300   :  { %201 = vperm.xlu1 %1037, %v197_v17  }
 0x301   :  { %v1059_v20 = vpop.eup %1058 }
 0x302   :  { %v198_v21 = vmul.f32 %v1059_v20, %v194_v18 }
 0x304   :  { %206 = vperm.xlu0 %1038, %v198_v21   ;;  %1040 = vset.pattern.permute.xlu1 %v1193_v22 }
 0x305   :  { %230 = vperm.xlu1 %1040, %v1329_v24  }
 0x308   :  { %1039 = vset.pattern.permute.xlu0 %v1193_v22 }
 0x309   :  { %226 = vperm.xlu0 %1039, %v1321_v19   ;;  %1041 = vset.pattern.permute.xlu1 %v1194_v25 }
 0x30a   :  { %285 = vperm.xlu1 %1041, %v282_v23  }
 0x30d   :  { %1042 = vset.pattern.permute.xlu0 %v1194_v25 }
 0x30e   :  { %288 = vperm.xlu0 %1042, %v283_v26  }
 0x37f   :  { %v202_v29 = vpop.permute.xlu1 %201 }
 0x380   :  { %v209_v30 = vmul.f32 %v202_v29, %v1334_v32  ;;  %v210_v31 = vmul.f32 %v202_v29, %v1336_v33 }
 0x382   :  { %v221_v42 = vadd.f32 %v215_v27, %v209_v30  ;;  %v222_v43 = vadd.f32 %v215_v27, %v210_v31  ;;  %v1047_v31 = vld [vmem:[#allocation6] sm:$0xff]  }
 0x383   :  { %v207_v34 = vpop.permute.xlu0 %206 }
 0x384   :  { %v211_v35 = vmul.f32 %v207_v34, %v1342_v38  ;;  %v212_v36 = vmul.f32 %v207_v34, %v1344_v39  ;;  %v231_v37 = vpop.permute.xlu1 %230  ;;  %v356_v34 = vld [vmem:[#allocation8] sm:$0x3] }
 0x386   :  { %v223_v40 = vadd.f32 %v219_v28, %v211_v35  ;;  %v224_v41 = vadd.f32 %v219_v28, %v212_v36 }
 0x388   :  { %v235_v44 = vmul.f32 %v231_v37, %v223_v40  ;;  %v236_v45 = vmul.f32 %v231_v37, %v224_v41  ;;  %v227_v46 = vpop.permute.xlu0 %226 }
 0x389   :  { %v233_v47 = vmul.f32 %v227_v46, %v221_v42  ;;  %v234_v48 = vmul.f32 %v227_v46, %v222_v43  ;;  %v286_v4 = vpop.permute.xlu1 %285 }
 0x38a   :  { %v997_v49 = vmul.f32 -1.442695, %v235_v44  ;;  %v998_v50 = vmul.f32 -1.442695, %v236_v45  ;;  %vm290_vm14 = vcmp.eq.s32.totalorder %v286_v4, 1  ;;  %v451_v4 = vsub.s32 1, %v1302_v9 }
 0x38b   :  { %v995_v32 = vmul.f32 -1.442695, %v233_v47  ;;  %v996_v51 = vmul.f32 -1.442695, %v234_v48 }
 0x38c   :  { %1060 = vpow2.f32 %v997_v49  ;;  %v1050_v49 = vld [vmem:[%s1723_s5 + $0x4] ss:$8 sps:$4 sm:$0xff]  }
 0x38d   :  { %1062 = vpow2.f32 %v998_v50  ;;  %v289_v2 = vpop.permute.xlu0 %288  ;;  %1006 = vmatprep.mubr.msk.bf16.mxu0 %vm309_vm15, %v1050_v49  ;;  %v1051_v50 = vld [vmem:[%s1724_s6] sm:$0xff]  }
 0x38e   :  { %1064 = vpow2.f32 %v995_v32  ;;  %vm291_vm13 = vcmp.eq.s32.totalorder %v289_v2, 1  ;;  %v1202_v32 = vmov 3  }
 0x38f   :  { %1066 = vpow2.f32 %v996_v51  ;;  %1043 = vset.pattern.permute.xlu0 %v1202_v32  ;;  %1044 = vset.pattern.permute.xlu1 %v1202_v32 }
 0x396   :  { %v1061_v33 = vpop.eup %1060 }
 0x397   :  { %v1063_v38 = vpop.eup %1062  ;;  %v251_v39 = vadd.f32 1.0, %v1061_v33 }
 0x398   :  { %v1065_v52 = vpop.eup %1064  ;;  %v252_v53 = vadd.f32 1.0, %v1063_v38 }
 0x399   :  { %v1067_v55 = vpop.eup %1066  ;;  %1068 = vrcp.f32 %v251_v39  ;;  %v249_v56 = vadd.f32 1.0, %v1065_v52 }
 0x39a   :  { %1070 = vrcp.f32 %v252_v53  ;;  %v250_v57 = vadd.f32 1.0, %v1067_v55 }
 0x39b   :  { %1072 = vrcp.f32 %v249_v56 }
 0x39c   :  { %1074 = vrcp.f32 %v250_v57 }
 0x3a3   :  { %v1069_v58 = vpop.eup %1068 }
 0x3a4   :  { %v1071_v59 = vpop.eup %1070  ;;  %vm263_vm8 = vcmp.ge.f32.partialorder %v1069_v58, 0.5 }
 0x3a5   :  { %v1073_v60 = vpop.eup %1072  ;;  %vm264_vm9 = vcmp.ge.f32.partialorder %v1071_v59, 0.5  ;;  %v267_v61 = vsel %vm263_vm8, %v223_v40, 0.0 }
 0x3a6   :  { %v1075_v62 = vpop.eup %1074  ;;  %v268_v63 = vsel %vm264_vm9, %v224_v41, 0.0  ;;  %vm261_vm10 = vcmp.ge.f32.partialorder %v1073_v60, 0.5  ;;  %v271_v0 = vsub.f32 %v223_v40, %v267_v61 }
 0x3a7   :  { %vm262_vm11 = vcmp.ge.f32.partialorder %v1075_v62, 0.5  ;;  %v265_v1 = vsel %vm261_vm10, %v221_v42, 0.0  ;;  %v272_v3 = vsub.f32 %v224_v41, %v268_v63 }
 0x3a8   :  { %v266_v5 = vsel %vm262_vm11, %v222_v43, 0.0  ;;  %v269_v7 = vsub.f32 %v221_v42, %v265_v1  ;;  %v275_v8 = vrot.slane %v271_v0, 4  ;;  %v1494_v0 = vld [vmem:[#allocation3] sm:$0xff] }
 0x3a9   :  { %v270_v10 = vsub.f32 %v222_v43, %v266_v5  ;;  %v276_v11 = vrot.slane %v272_v3, 4 }
 0x3aa   :  { %v273_v12 = vrot.slane %v269_v7, 4 }
 0x3ab   :  { %v274_v13 = vrot.slane %v270_v10, 4  ;;  %v480_v10 = vsub.s32 2, %v1302_v9 }
 0x3ac   :  { %v278_v14 = vsel %vm277_vm12, %v273_v12, %v275_v8  ;;  %v280_v15 = vsel %vm277_vm12, %v275_v8, %v273_v12 }
 0x3ad   :  { %v279_v16 = vsel %vm277_vm12, %v274_v13, %v276_v11  ;;  %v281_v17 = vsel %vm277_vm12, %v276_v11, %v274_v13  ;;  %v294_v18 = vsel %vm291_vm13, %v280_v15, %v278_v14  ;;  %v292_v20 = vsel %vm290_vm14, %v278_v14, %v280_v15 }
 0x3ae   :  { %v295_v21 = vsel %vm291_vm13, %v281_v17, %v279_v16  ;;  %v293_v22 = vsel %vm290_vm14, %v279_v16, %v281_v17  ;;  %v296_v23 = vadd.f32 %v292_v20, %v265_v1  ;;  %v298_v26 = vadd.f32 %v294_v18, %v267_v61  ;;  %v1496_v1 = vld [vmem:[#allocation3 + $0x8] sm:$0xff] }
 0x3af   :  { %v297_v27 = vadd.f32 %v293_v22, %v266_v5  ;;  %v299_v28 = vadd.f32 %v295_v21, %v268_v63  ;;  %v422_v63 = vsub.s32 0, %v1302_v9  ;;  %v452_v13 = vrot.slane %v1494_v0, %v451_v4 }
 0x3b0   :  { %v300_v29 = vpack.c.bf16 %v298_v26, %v296_v23  ;;  %v456_v14 = vrot.slane %v1496_v1, %v451_v4  ;;  %v481_v26 = vrot.slane %v1494_v0, %v480_v10 }
 0x3b1   :  { %v301_v30 = vpack.c.bf16 %v299_v28, %v297_v27  ;;  %v423_v5 = vrot.slane %v1494_v0, %v422_v63 }
 0x3b3   :  { %313 = vmatprep.subr.bf16.mxu1 %v301_v30 }
 0x3b4   :  { %314 = vmatpush1.bf16.msra.mxu1 %v300_v29 }
 0x3b5   :  { %360 = vmatprep.subr.bf16.mxu1 %v301_v30 }
 0x3b7   :  { %1000 = vmatmul.mubr.msk.bf16.vlgmr.msra.gmra.mrb[0].mxu1 %vm309_vm15, %v1047_v31  ;;  %v485_v31 = vrot.slane %v1496_v1, %v480_v10 }
 0x3b8   :  { %361 = vmatpush1.bf16.msra.mxu1 %v300_v29  ;;  %392 = vmatprep.mubr.bf16.mxu1 %v1192_v54 }
 0x3bf   :  { %1001 = vmatmul.mubr.msk.bf16.vlgmr.msra.gmra.mrb[4].mxu1 %vm309_vm15, %v356_v34  ;;  %v509_v34 = vsub.s32 3, %v1302_v9  ;;  %vm860_vm15 = vcmp.lt.s32.totalorder %v1302_v9, 2 }
 0x3c0   :  { %778 = vmatprep.mubr.bf16.mxu1 %v1192_v54 }
 0x48a   :  { %v1401_v35 = vpop.f32.mrb[0].mxu1 }
 0x48b   :  { %436 = vrot.lane.b32.xlu0 %v1401_v35, %s1187_s25  ;;  %405 = vrot.lane.b32.xlu1 %v1401_v35, %s1195_s1  ;;  %v1406_v36 = vpop.f32.mrb[1].mxu1 }
 0x48c   :  { %v1408_v37 = vpop.f32.mrb[2].mxu1 }
 0x48d   :  { %v1410_v40 = vpop.f32.mrb[3].mxu1  ;;  %v523_v41 = vpack.c.bf16 %v1408_v37, %v1401_v35 }
 0x48e   :  { %v524_v54 = vpack.c.bf16 %v1410_v40, %v1406_v36 }
 0x48f   :  { %465 = vrot.lane.b32.xlu0 %v1401_v35, %s1196_s29  ;;  %407 = vrot.lane.b32.xlu1 %v1408_v37, %s1195_s1 }
 0x492   :  { %v394_v42 = vpop.f32.mrb[4].mxu1 }
 0x493   :  { %494 = vrot.lane.b32.xlu0 %v1401_v35, %s1197_s30  ;;  %438 = vrot.lane.b32.xlu1 %v1408_v37, %s1187_s25  ;;  %v728_v43 = vpack.c.bf16 %v394_v42, %v394_v42  ;;  %v396_v44 = vpop.f32.mrb[5].mxu1 }
 0x494   :  { %v729_v45 = vpack.c.bf16 %v396_v44, %v396_v44  ;;  %v398_v46 = vpop.f32.mrb[6].mxu1 }
 0x495   :  { %v741_v47 = vsel %vm739_vm4, %v728_v43, 0  ;;  %v399_v48 = vpop.f32.mrb[7].mxu1 }
 0x496   :  { %1008 = vmatprep.subr.msk.bf16.mxu1 %vm739_vm4, %v729_v45 }
 0x497   :  { %527 = vrot.lane.b32.xlu0 %v1401_v35, %s1198_s8  ;;  %467 = vrot.lane.b32.xlu1 %v1408_v37, %s1196_s29 }
 0x498   :  { %747 = vmatpush1.bf16.msra.mxu1 %v741_v47 }
 0x49b   :  { %556 = vrot.lane.b32.xlu0 %v1401_v35, %s1199_s9  ;;  %496 = vrot.lane.b32.xlu1 %v1408_v37, %s1197_s30 }
 0x49c   :  { %1009 = vmatmul.mubr.msk.bf16.vlgmr.msra.gmra.mrb[8].mxu1 %vm735_vm5, %v1051_v50 }
 0x49f   :  { %585 = vrot.lane.b32.xlu0 %v1401_v35, %s1200_s10  ;;  %529 = vrot.lane.b32.xlu1 %v1408_v37, %s1198_s8 }
 0x4a3   :  { %409 = vrot.lane.b32.xlu0 %v1406_v36, %s1195_s1  ;;  %558 = vrot.lane.b32.xlu1 %v1408_v37, %s1199_s9 }
 0x4a7   :  { %440 = vrot.lane.b32.xlu0 %v1406_v36, %s1187_s25  ;;  %587 = vrot.lane.b32.xlu1 %v1408_v37, %s1200_s10 }
 0x4ab   :  { %469 = vrot.lane.b32.xlu0 %v1406_v36, %s1196_s29  ;;  %411 = vrot.lane.b32.xlu1 %v1410_v40, %s1195_s1 }
 0x4af   :  { %498 = vrot.lane.b32.xlu0 %v1406_v36, %s1197_s30  ;;  %442 = vrot.lane.b32.xlu1 %v1410_v40, %s1187_s25 }
 0x4b3   :  { %614 = vrot.lane.b32.xlu0 %v1401_v35, %s1201_s11  ;;  %471 = vrot.lane.b32.xlu1 %v1410_v40, %s1196_s29 }
 0x4b7   :  { %531 = vrot.lane.b32.xlu0 %v1406_v36, %s1198_s8  ;;  %500 = vrot.lane.b32.xlu1 %v1410_v40, %s1197_s30 }
 0x4bb   :  { %560 = vrot.lane.b32.xlu0 %v1406_v36, %s1199_s9  ;;  %616 = vrot.lane.b32.xlu1 %v1408_v37, %s1201_s11 }
 0x4bf   :  { %589 = vrot.lane.b32.xlu0 %v1406_v36, %s1200_s10  ;;  %533 = vrot.lane.b32.xlu1 %v1410_v40, %s1198_s8 }
 0x4c3   :  { %618 = vrot.lane.b32.xlu0 %v1406_v36, %s1201_s11  ;;  %562 = vrot.lane.b32.xlu1 %v1410_v40, %s1199_s9 }
 0x4c7   :  { %591 = vrot.lane.b32.xlu1 %v1410_v40, %s1200_s10  ;;  %664 = vperm.xlu0 %1043, %v1321_v19  }
 0x4cb   :  { %620 = vrot.lane.b32.xlu1 %v1410_v40, %s1201_s11  ;;  %1046 = vset.pattern.permute.xlu0 %v1194_v25 }
 0x4cf   :  { %668 = vperm.xlu1 %1044, %v1329_v24  }
 0x4d3   :  { %1045 = vset.pattern.permute.xlu1 %v1194_v25  ;;  %v1489_v25 = vand.u32 127, %v83_v6  ;;  %v427_v6 = vrot.slane %v1496_v1, %v422_v63 }
 0x4d5   :  { %vm415_vm6 = vcmp.lt.s32.totalorder %v1489_v25, 17  ;;  %vm444_vm7 = vcmp.lt.s32.totalorder %v1489_v25, 16  ;;  %vm473_vm8 = vcmp.lt.s32.totalorder %v1489_v25, 15  ;;  %vm502_vm9 = vcmp.lt.s32.totalorder %v1489_v25, 1 }
 0x4d6   :  { %vm535_vm10 = vcmp.lt.s32.totalorder %v1489_v25, 127  ;;  %vm564_vm11 = vcmp.lt.s32.totalorder %v1489_v25, 113  ;;  %vm593_vm13 = vcmp.lt.s32.totalorder %v1489_v25, 112  ;;  %vm622_vm14 = vcmp.lt.s32.totalorder %v1489_v25, 111 }
 0x4fd   :  { %v437_v51 = vpop.permute.xlu0 %436  ;;  %v406_v33 = vpop.permute.xlu1 %405 }
 0x501   :  { %v466_v38 = vpop.permute.xlu0 %465  ;;  %v408_v39 = vpop.permute.xlu1 %407 }
 0x505   :  { %v1476_v52 = vpop.permute.xlu0 %494  ;;  %v439_v53 = vpop.permute.xlu1 %438 }
 0x509   :  { %v1478_v55 = vpop.permute.xlu0 %527  ;;  %v468_v56 = vpop.permute.xlu1 %467 }
 0x50d   :  { %v1480_v57 = vpop.permute.xlu0 %556  ;;  %v1482_v58 = vpop.permute.xlu1 %496 }
 0x511   :  { %v1484_v59 = vpop.permute.xlu0 %585  ;;  %v1486_v60 = vpop.permute.xlu1 %529 }
 0x515   :  { %v410_v61 = vpop.permute.xlu0 %409  ;;  %v1491_v62 = vpop.permute.xlu1 %558 }
 0x516   :  { %v416_v7 = vsel %vm415_vm6, %v406_v33, %v410_v61  ;;  %v418_v8 = vsel %vm415_vm6, %v410_v61, %v406_v33 }
 0x517   :  { %v428_v17 = vmul.f32 %v423_v5, %v418_v8  ;;  %v429_v20 = vmul.f32 %v427_v6, %v416_v7 }
 0x519   :  { %v441_v2 = vpop.permute.xlu0 %440  ;;  %v1499_v3 = vpop.permute.xlu1 %587 }
 0x51a   :  { %v445_v22 = vsel %vm444_vm7, %v437_v51, %v441_v2  ;;  %v447_v23 = vsel %vm444_vm7, %v441_v2, %v437_v51 }
 0x51b   :  { %v457_v44 = vmul.f32 %v452_v13, %v447_v23  ;;  %v458_v45 = vmul.f32 %v456_v14, %v445_v22 }
 0x51d   :  { %v470_v11 = vpop.permute.xlu0 %469  ;;  %v412_v12 = vpop.permute.xlu1 %411 }
 0x51e   :  { %v417_v15 = vsel %vm415_vm6, %v408_v39, %v412_v12  ;;  %v419_v16 = vsel %vm415_vm6, %v412_v12, %v408_v39  ;;  %v474_v48 = vsel %vm473_vm8, %v466_v38, %v470_v11  ;;  %v476_v49 = vsel %vm473_vm8, %v470_v11, %v466_v38 }
 0x51f   :  { %v430_v18 = vmul.f32 %v423_v5, %v419_v16  ;;  %v431_v21 = vmul.f32 %v427_v6, %v417_v15  ;;  %v510_v39 = vrot.slane %v1494_v0, %v509_v34  ;;  %v486_v2 = vmul.f32 %v481_v26, %v476_v49 }
 0x520   :  { %v487_v38 = vmul.f32 %v485_v31, %v474_v48 }
 0x521   :  { %v499_v27 = vpop.permute.xlu0 %498  ;;  %v443_v28 = vpop.permute.xlu1 %442  ;;  %v433_v29 = vpack.c.bf16 %v431_v21, %v429_v20  ;;  %v432_v30 = vpack.c.bf16 %v430_v18, %v428_v17 }
 0x522   :  { %v446_v42 = vsel %vm444_vm7, %v439_v53, %v443_v28  ;;  %v448_v43 = vsel %vm444_vm7, %v443_v28, %v439_v53  ;;  %v514_v53 = vrot.slane %v1496_v1, %v509_v34  ;;  %v503_v6 = vsel %vm502_vm9, %v1476_v52, %v499_v27 }
 0x523   :  { %v459_v46 = vmul.f32 %v452_v13, %v448_v43  ;;  %v460_v47 = vmul.f32 %v456_v14, %v446_v42  ;;  %683 = vmatprep.subr.bf16.mxu0 %v433_v29  ;;  %v505_v7 = vsel %vm502_vm9, %v499_v27, %v1476_v52  ;;  %v571_v52 = vsub.s32 6, %v1302_v9 }
 0x524   :  { %684 = vmatpush1.bf16.msra.mxu0 %v432_v30  ;;  %v515_v15 = vmul.f32 %v510_v39, %v505_v7  ;;  %v516_v16 = vmul.f32 %v514_v53, %v503_v6  ;;  %v600_v34 = vsub.s32 7, %v1302_v9  ;;  %v1003_v7 = vld [vmem:[#allocation3 + $0x18] ss:$0 sm:$0xff] }
 0x525   :  { %v1525_v50 = vpop.permute.xlu0 %614  ;;  %v472_v32 = vpop.permute.xlu1 %471  ;;  %v462_v51 = vpack.c.bf16 %v460_v47, %v458_v45  ;;  %v461_v33 = vpack.c.bf16 %v459_v46, %v457_v44  ;;  %v572_v29 = vrot.slane %v1494_v0, %v571_v52 }
 0x526   :  { %v475_v61 = vsel %vm473_vm8, %v468_v56, %v472_v32  ;;  %v477_v63 = vsel %vm473_vm8, %v472_v32, %v468_v56  ;;  %v542_v56 = vsub.s32 5, %v1302_v9  ;;  %v601_v49 = vrot.slane %v1494_v0, %v600_v34 }
 0x527   :  { %v488_v4 = vmul.f32 %v481_v26, %v477_v63  ;;  %v489_v5 = vmul.f32 %v485_v31, %v475_v61  ;;  %685 = vmatprep.subr.bf16.mxu0 %v462_v51  ;;  %v576_v31 = vrot.slane %v1496_v1, %v571_v52  ;;  %v605_v32 = vrot.slane %v1496_v1, %v600_v34  ;;  %v1048_v52 = vld [vmem:[%s1723_s5] ss:$8 sps:$4 sm:$0xff]   ;;  %s1203_s5 = smov 124  }
 0x528   :  { %686 = vmatpush1.bf16.msra.mxu0 %v461_v33  ;;  %v543_v26 = vrot.slane %v1494_v0, %v542_v56  ;;  %v547_v27 = vrot.slane %v1496_v1, %v542_v56 }
 0x529   :  { %v532_v8 = vpop.permute.xlu0 %531  ;;  %v501_v10 = vpop.permute.xlu1 %500  ;;  %v491_v11 = vpack.c.bf16 %v489_v5, %v487_v38  ;;  %v490_v12 = vpack.c.bf16 %v488_v4, %v486_v2 }
 0x52a   :  { %v504_v13 = vsel %vm502_vm9, %v1482_v58, %v501_v10  ;;  %v506_v14 = vsel %vm502_vm9, %v501_v10, %v1482_v58  ;;  %v536_v58 = vsel %vm535_vm10, %v1478_v55, %v532_v8  ;;  %v538_v28 = vsel %vm535_vm10, %v532_v8, %v1478_v55 }
 0x52b   :  { %v517_v17 = vmul.f32 %v510_v39, %v506_v14  ;;  %v518_v18 = vmul.f32 %v514_v53, %v504_v13  ;;  %687 = vmatprep.subr.bf16.mxu0 %v491_v11  ;;  %v548_v43 = vmul.f32 %v543_v26, %v536_v58  ;;  %v549_v44 = vmul.f32 %v547_v27, %v538_v28 }
 0x52c   :  { %688 = vmatpush1.bf16.msra.mxu0 %v490_v12 }
 0x52d   :  { %v561_v20 = vpop.permute.xlu0 %560  ;;  %v1548_v21 = vpop.permute.xlu1 %616  ;;  %v520_v22 = vpack.c.bf16 %v518_v18, %v516_v16  ;;  %v519_v23 = vpack.c.bf16 %v517_v17, %v515_v15 }
 0x52e   :  { %v565_v36 = vsel %vm564_vm11, %v1480_v57, %v561_v20  ;;  %v567_v40 = vsel %vm564_vm11, %v561_v20, %v1480_v57 }
 0x52f   :  { %689 = vmatprep.subr.bf16.mxu0 %v520_v22  ;;  %v577_v33 = vmul.f32 %v572_v29, %v565_v36  ;;  %v578_v35 = vmul.f32 %v576_v31, %v567_v40 }
 0x530   :  { %690 = vmatpush1.bf16.msra.mxu0 %v519_v23 }
 0x531   :  { %v534_v30 = vpop.permute.xlu1 %533  ;;  %691 = vmatprep.subr.bf16.mxu0 %v524_v54  ;;  %v590_v45 = vpop.permute.xlu0 %589 }
 0x532   :  { %v537_v42 = vsel %vm535_vm10, %v1486_v60, %v534_v30  ;;  %v539_v55 = vsel %vm535_vm10, %v534_v30, %v1486_v60  ;;  %v594_v39 = vsel %vm593_vm13, %v1484_v59, %v590_v45  ;;  %v596_v0 = vsel %vm593_vm13, %v590_v45, %v1484_v59  ;;  %v1002_v59 = vld [vmem:[#allocation3 + $0x10] ss:$0 sm:$0xff] }
 0x533   :  { %v550_v46 = vmul.f32 %v543_v26, %v537_v42  ;;  %v551_v47 = vmul.f32 %v547_v27, %v539_v55  ;;  %v606_v38 = vmul.f32 %v601_v49, %v594_v39  ;;  %v607_v4 = vmul.f32 %v605_v32, %v596_v0 }
 0x534   :  { %692 = vmatpush1.bf16.msra.mxu0 %v523_v41 }
 0x535   :  { %v563_v54 = vpop.permute.xlu1 %562  ;;  %v553_v60 = vpack.c.bf16 %v551_v47, %v549_v44  ;;  %v552_v48 = vpack.c.bf16 %v550_v46, %v548_v43  ;;  %v619_v1 = vpop.permute.xlu0 %618 }
 0x536   :  { %v566_v51 = vsel %vm564_vm11, %v1491_v62, %v563_v54  ;;  %v568_v57 = vsel %vm564_vm11, %v563_v54, %v1491_v62  ;;  %v623_v8 = vsel %vm622_vm14, %v1525_v50, %v619_v1  ;;  %v625_v10 = vsel %vm622_vm14, %v619_v1, %v1525_v50 }
 0x537   :  { %v579_v37 = vmul.f32 %v572_v29, %v566_v51  ;;  %v580_v41 = vmul.f32 %v576_v31, %v568_v57  ;;  %693 = vmatprep.subr.bf16.mxu0 %v553_v60  ;;  %v635_v14 = vmul.f32 %v1002_v59, %v623_v8  ;;  %v636_v15 = vmul.f32 %v1003_v7, %v625_v10 }
 0x538   :  { %694 = vmatpush1.bf16.msra.mxu0 %v552_v48 }
 0x539   :  { %v592_v53 = vpop.permute.xlu1 %591  ;;  %v582_v61 = vpack.c.bf16 %v580_v41, %v578_v35  ;;  %v581_v62 = vpack.c.bf16 %v579_v37, %v577_v33 }
 0x53a   :  { %v595_v63 = vsel %vm593_vm13, %v1499_v3, %v592_v53  ;;  %v597_v2 = vsel %vm593_vm13, %v592_v53, %v1499_v3 }
 0x53b   :  { %v608_v5 = vmul.f32 %v601_v49, %v595_v63  ;;  %v609_v6 = vmul.f32 %v605_v32, %v597_v2  ;;  %695 = vmatprep.subr.bf16.mxu0 %v582_v61 }
 0x53c   :  { %696 = vmatpush1.bf16.msra.mxu0 %v581_v62 }
 0x53d   :  { %v621_v11 = vpop.permute.xlu1 %620  ;;  %v611_v12 = vpack.c.bf16 %v609_v6, %v607_v4  ;;  %v610_v56 = vpack.c.bf16 %v608_v5, %v606_v38 }
 0x53e   :  { %v624_v3 = vsel %vm622_vm14, %v1548_v21, %v621_v11  ;;  %v626_v13 = vsel %vm622_vm14, %v621_v11, %v1548_v21 }
 0x53f   :  { %v637_v16 = vmul.f32 %v1002_v59, %v624_v3  ;;  %v638_v17 = vmul.f32 %v1003_v7, %v626_v13  ;;  %697 = vmatprep.subr.bf16.mxu0 %v611_v12 }
 0x540   :  { %698 = vmatpush1.bf16.msra.mxu0 %v610_v56 }
 0x541   :  { %v640_v18 = vpack.c.bf16 %v638_v17, %v636_v15  ;;  %v639_v50 = vpack.c.bf16 %v637_v16, %v635_v14 }
 0x543   :  { %699 = vmatprep.subr.bf16.mxu0 %v640_v18 }
 0x544   :  { %700 = vmatpush1.bf16.msra.mxu0 %v639_v50 }
 0x546   :  { %v665_v27 = vpop.permute.xlu0 %664 }
 0x547   :  { %716 = vmatmul.mubr.bf16.vlgmr.msra.gmra.mrb[0].mxu0 %v1048_v52 }
 0x54e   :  { %v669_v28 = vpop.permute.xlu1 %668 }
 0x56f   :  { %v1617_v20 = vpop.f32.mrb[8].mxu1 }
 0x570   :  { %v1619_v22 = vpop.f32.mrb[9].mxu1 }
 0x571   :  { %v1621_v25 = vpop.f32.mrb[10].mxu1  ;;  %v798_v26 = vadd.f32 %v1619_v22, %v1617_v20 }
 0x572   :  { %v1623_v21 = vpop.f32.mrb[11].mxu1 }
 0x573   :  { %v801_v23 = vadd.f32 %v1623_v21, %v1621_v25 }
 0x61a   :  { %v717_v58 = vpop.f32.mrb[0].mxu0 }
 0x61b   :  { %v1629_v29 = vadd.f32 %v717_v58, %v665_v27  ;;  %v719_v30 = vpop.f32.mrb[1].mxu0 }
 0x61c   :  { %v1631_v31 = vadd.f32 %v719_v30, %v665_v27  ;;  %v721_v34 = vpop.f32.mrb[2].mxu0 }
 0x61d   :  { %v1633_v42 = vadd.f32 %v721_v34, %v669_v28  ;;  %v723_v55 = vpop.f32.mrb[3].mxu0 }
 0x61e   :  { %v1635_v43 = vadd.f32 %v723_v55, %v669_v28  ;;  %v789_v44 = vadd.f32 %v1631_v31, %v1629_v29 }
 0x620   :  { %790 = vadd.xlane.f32.xlu1 %v789_v44  ;;  %v792_v45 = vadd.f32 %v1635_v43, %v1633_v42 }
 0x622   :  { %793 = vadd.xlane.f32.xlu0 %v792_v45 }
 0x624   :  { %802 = vadd.xlane.f32.xlu1 %v801_v23 }
 0x626   :  { %799 = vadd.xlane.f32.xlu0 %v798_v26 }
 0x6ad   :  { %v791_v46 = vpop.xlane.xlu1 %790 }
 0x6ae   :  { %v796_v60 = vmul.f32 0.00390625, %v791_v46 }
 0x6af   :  { %v794_v47 = vpop.xlane.xlu0 %793 }
 0x6b0   :  { %v797_v48 = vmul.f32 0.00390625, %v794_v47 }
 0x6b1   :  { %v803_v36 = vpop.xlane.xlu1 %802 }
 0x6b2   :  { %v805_v40 = vmul.f32 0.00390625, %v803_v36 }
 0x6b3   :  { %v800_v54 = vpop.xlane.xlu0 %799 }
 0x6b4   :  { %v804_v49 = vmul.f32 0.00390625, %v800_v54  ;;  %v807_v32 = vmax.f32 %v797_v48, %v805_v40 }
 0x6b6   :  { %v806_v51 = vmax.f32 %v796_v60, %v804_v49 }
 0x6b8   :  { %v808_v57 = vmax.f32 %v806_v51, %v807_v32 }
 0x6ba   :  { %v809_v33 = vrot.slane %v808_v57, 4 }
 0x6bc   :  { %v810_v35 = vmax.f32 %v808_v57, %v809_v33 }
 0x6be   :  { %v811_v37 = vrot.slane %v810_v35, 2 }
 0x6c0   :  { %v812_v41 = vmax.f32 %v810_v35, %v811_v37 }
 0x6c2   :  { %v813_v39 = vrot.slane %v812_v41, 1 }
 0x6c4   :  { %v814_v0 = vmax.f32 %v812_v41, %v813_v39 }
 0x6c6   :  { %v815_v1 = vsub.f32 %v796_v60, %v814_v0  ;;  %v816_v53 = vsub.f32 %v797_v48, %v814_v0  ;;  %v821_v61 = vsub.f32 %v804_v49, %v814_v0  ;;  %v822_v62 = vsub.f32 %v805_v40, %v814_v0 }
 0x6c8   :  { %v823_v63 = vmul.f32 1.442695, %v821_v61  ;;  %v817_v2 = vmul.f32 1.442695, %v815_v1  ;;  %v819_v38 = vmul.f32 1.442695, %v816_v53 }
 0x6c9   :  { %v825_v4 = vmul.f32 1.442695, %v822_v62 }
 0x6ca   :  { %1076 = vpow2.f32 %v823_v63 }
 0x6cb   :  { %1078 = vpow2.f32 %v817_v2 }
 0x6cc   :  { %1080 = vpow2.f32 %v819_v38 }
 0x6cd   :  { %1082 = vpow2.f32 %v825_v4 }
 0x6d4   :  { %v1641_v5 = vpop.eup %1076 }
 0x6d5   :  { %v1643_v6 = vpop.eup %1078 }
 0x6d6   :  { %v1645_v59 = vpop.eup %1080  ;;  %v827_v7 = vadd.f32 %v1643_v6, %v1641_v5 }
 0x6d7   :  { %v1649_v8 = vpop.eup %1082 }
 0x6d8   :  { %v828_v10 = vadd.f32 %v1649_v8, %v1645_v59  ;;  %v829_v11 = vrot.slane %v827_v7, 4 }
 0x6da   :  { %v830_v12 = vrot.slane %v828_v10, 4 }
 0x6dc   :  { %v832_v56 = vsel %vm277_vm12, %v830_v12, %v829_v11  ;;  %v831_v3 = vsel %vm277_vm12, %v829_v11, %v830_v12  ;;  %vm855_vm12 = vcmp.lt.s32.totalorder %v1302_v9, 6 }
 0x6dd   :  { %837 = vrot.lane.b32.xlu1 %v832_v56, %s1184_s12  ;;  %835 = vrot.lane.b32.xlu0 %v831_v3, %s1184_s12  ;;  %s1204_s12 = smov 5  }
 0x74f   :  { %v838_v13 = vpop.permute.xlu1 %837  ;;  %v836_v14 = vpop.permute.xlu0 %835 }
 0x750   :  { %v841_v15 = vsel %vm73_vm2, %v836_v14, %v838_v13  ;;  %v842_v16 = vsel %vm74_vm3, %v838_v13, %v836_v14 }
 0x751   :  { %v843_v17 = vadd.f32 %v841_v15, %v827_v7  ;;  %v844_v18 = vadd.f32 %v842_v16, %v828_v10 }
 0x753   :  { %849 = vrot.lane.b32.xlu0 %v844_v18, %s1203_s5  ;;  %847 = vrot.lane.b32.xlu1 %v843_v17, %s1203_s5 }
 0x7c5   :  { %v850_v50 = vpop.permute.xlu0 %849  ;;  %v848_v52 = vpop.permute.xlu1 %847 }
 0x7c6   :  { %v854_v23 = vrot.slane %v850_v50, 2  ;;  %v853_v26 = vrot.slane %v848_v52, 2  ;;  %v859_v27 = vrot.slane %v850_v50, 6  ;;  %v858_v58 = vrot.slane %v848_v52, 6 }
 0x7c8   :  { %v857_v28 = vsel %vm855_vm12, %v854_v23, %v853_v26  ;;  %v856_v30 = vsel %vm855_vm12, %v853_v26, %v854_v23  ;;  %v861_v34 = vsel %vm860_vm15, %v858_v58, %v859_v27  ;;  %v862_v55 = vsel %vm860_vm15, %v859_v27, %v858_v58 }
 0x7c9   :  { %867 = vrot.lane.b32.xlu0 %v857_v28, %s1204_s12  ;;  %865 = vrot.lane.b32.xlu1 %v856_v30, %s1204_s12 }
 0x7cd   :  { %875 = vrot.lane.b32.xlu0 %v861_v34, %s1204_s12  ;;  %873 = vrot.lane.b32.xlu1 %v862_v55, %s1204_s12 }
 0x83b   :  { %v868_v44 = vpop.permute.xlu0 %867  ;;  %v866_v45 = vpop.permute.xlu1 %865 }
 0x83f   :  { %v876_v46 = vpop.permute.xlu0 %875  ;;  %v874_v47 = vpop.permute.xlu1 %873 }
 0x840   :  { %v880_v36 = vsel %vm74_vm3, %v868_v44, %v876_v46  ;;  %v879_v40 = vsel %vm73_vm2, %v866_v45, %v874_v47 }
 0x841   :  { %885 = vrot.lane.b32.xlu0 %v880_v36, %s1198_s8  ;;  %883 = vrot.lane.b32.xlu1 %v879_v40, %s1198_s8 }
 0x8b3   :  { %v886_v54 = vpop.permute.xlu0 %885  ;;  %v884_v60 = vpop.permute.xlu1 %883 }
 0x8b4   :  { %v890_v48 = vadd.f32 %v886_v54, %v844_v18  ;;  %v889_v49 = vadd.f32 %v884_v60, %v843_v17 }
 0x8b6   :  { %895 = vrot.lane.b32.xlu0 %v890_v48, %s1203_s5  ;;  %893 = vrot.lane.b32.xlu1 %v889_v49, %s1203_s5 }
 0x928   :  { %v896_v32 = vpop.permute.xlu0 %895  ;;  %v894_v51 = vpop.permute.xlu1 %893 }
 0x929   :  { %v900_v57 = vrot.slane %v896_v32, 1  ;;  %v899_v33 = vrot.slane %v894_v51, 1  ;;  %v904_v35 = vrot.slane %v896_v32, 7  ;;  %v903_v37 = vrot.slane %v894_v51, 7 }
 0x92b   :  { %v902_v41 = vsel %vm85_vm1, %v900_v57, %v899_v33  ;;  %v901_v39 = vsel %vm85_vm1, %v899_v33, %v900_v57  ;;  %v905_v0 = vsel %vm90_vm0, %v903_v37, %v904_v35  ;;  %v906_v1 = vsel %vm90_vm0, %v904_v35, %v903_v37 }
 0x92c   :  { %911 = vrot.lane.b32.xlu0 %v902_v41, %s1190_s0  ;;  %909 = vrot.lane.b32.xlu1 %v901_v39, %s1190_s0 }
 0x930   :  { %919 = vrot.lane.b32.xlu0 %v905_v0, %s1190_s0  ;;  %917 = vrot.lane.b32.xlu1 %v906_v1, %s1190_s0 }
 0x99e   :  { %v912_v53 = vpop.permute.xlu0 %911  ;;  %v910_v61 = vpop.permute.xlu1 %909 }
 0x9a2   :  { %v920_v62 = vpop.permute.xlu0 %919  ;;  %v918_v63 = vpop.permute.xlu1 %917 }
 0x9a3   :  { %v924_v2 = vsel %vm74_vm3, %v912_v53, %v920_v62  ;;  %v923_v38 = vsel %vm73_vm2, %v910_v61, %v918_v63 }
 0x9a4   :  { %929 = vrot.lane.b32.xlu0 %v924_v2, %s1205_s17  ;;  %927 = vrot.lane.b32.xlu1 %v923_v38, %s1205_s17 }
 0xa16   :  { %v930_v4 = vpop.permute.xlu0 %929  ;;  %v928_v9 = vpop.permute.xlu1 %927 }
 0xa17   :  { %v934_v7 = vadd.f32 %v930_v4, %v890_v48  ;;  %v933_v10 = vadd.f32 %v928_v9, %v889_v49 }
 0xa19   :  { %1084 = vrcp.f32 %v934_v7 }
 0xa1a   :  { %1086 = vrcp.f32 %v933_v10 }
 0xa23   :  { %v1085_v11 = vpop.eup %1084 }
 0xa24   :  { %v1087_v12 = vpop.eup %1086  ;;  %v938_v56 = vmul.f32 %v1085_v11, %v1645_v59  ;;  %v954_v24 = vmul.f32 %v1085_v11, %v1649_v8 }
 0xa25   :  { %v937_v3 = vmul.f32 %v1087_v12, %v1643_v6  ;;  %v953_v19 = vmul.f32 %v1087_v12, %v1641_v5 }
 0xa26   :  { %946 = vperm.xlu0 %1046, %v938_v56  }
 0xa27   :  { %941 = vperm.xlu1 %1045, %v937_v3  }
 0xa2b   :  { %957 = vperm.xlu1 %1045, %v953_v19  }
 0xa2f   :  { %962 = vperm.xlu1 %1045, %v954_v24  }
 0xaa5   :  { %v947_v18 = vpop.permute.xlu0 %946 }
 0xaa6   :  { %v942_v13 = vpop.permute.xlu1 %941  ;;  %v951_v5 = vmul.f32 %v947_v18, %v1633_v42  ;;  %v952_v8 = vmul.f32 %v947_v18, %v1635_v43 }
 0xaa7   :  { %v949_v15 = vmul.f32 %v942_v13, %v1629_v29  ;;  %v950_v16 = vmul.f32 %v942_v13, %v1631_v31 }
 0xaaa   :  { %v958_v14 = vpop.permute.xlu1 %957 }
 0xaab   :  { %v965_v17 = vmul.f32 %v958_v14, %v1617_v20  ;;  %v966_v59 = vmul.f32 %v958_v14, %v1619_v22 }
 0xaad   :  { %v969_v6 = vadd.f32 %v965_v17, %v949_v15  ;;  %v970_v50 = vadd.f32 %v966_v59, %v950_v16 }
 0xaae   :  { %v963_v52 = vpop.permute.xlu1 %962 }
 0xaaf   :  { %973 = vst [vmem:[#allocation9] sm:$0xff] %v969_v6  ;;  %974 = vst [vmem:[#allocation9 + $0x8] sm:$0xff] %v970_v50  ;;  %v967_v29 = vmul.f32 %v963_v52, %v1621_v25  ;;  %v968_v31 = vmul.f32 %v963_v52, %v1623_v21 }
 0xab1   :  { %v971_v23 = vadd.f32 %v967_v29, %v951_v5  ;;  %v972_v20 = vadd.f32 %v968_v31, %v952_v8 }
 0xab3   :  { %975 = vst [vmem:[#allocation9 + $0x10] sm:$0xff] %v971_v23  ;;  %976 = vst [vmem:[#allocation9 + $0x18] sm:$0xff] %v972_v20 }
 0xab4   :  { %1165 = shalt.err (!%p1162_p0)
}
 0xab5   :  { %s1166_s23 = scalar_lea.hbm %s1725_s7, 512 }
 0xab6   :  { %p1167_p1 = scmp.ne.s32.totalorder %s1725_s7, %s1166_s23  ;;  %p1170_p2 = scmp.lt.u32.totalorder %s1166_s23, %s1725_s7 }
 0xab8   :  { %p1172_p3 = pnand %p1170_p2, %p1167_p1 }
 0xaba   :  { %1175 = shalt.err (!%p1172_p3)
}
 0xabb   :  { %988 = dma.vmem_to_hbm [thread:$0]  %s983_s19, 512, %s1725_s7, [#allocation5], %s1186_s3, %s1186_s3, %s1187_s25  }
 0xabc   :  { %1180 = dma.done.wait [#allocation5], 512  }
 0xabd   :  { %1181 = vsyncadd [#allocation5], 4294966784 }
 0xabe   :  { %992 = vsyncpa [#allocation4], 1 }
 0xabf   :  { %993 = vsyncpa [#allocation7], 1 }
 0xac0   :  { %994 = vsyncpa [#allocation5], 1 }

</bundles_post_ra>
